<compile_context>
chip_gen: v5e
topology: v5e:2x2
jax: 0.10.0
libtpu: 0.0.40
codegen_flags: <defaults>
</compile_context>

<pallas_src>
import functools

import jax
import jax.numpy as jnp
from jax.experimental import pallas as pl
from jax.experimental.pallas import tpu as pltpu

# ----- problem sizes (small, but consistent with the module's forward) -----
N_PAIRS = 2                       # len(graph_sizes)
N_GRAPHS = 2 * N_PAIRS            # query/corpus interleaved
NODES_PER_GRAPH = 4
EDGES_PER_GRAPH = 8
N_NODES = N_GRAPHS * NODES_PER_GRAPH     # 16
N_EDGES = N_GRAPHS * EDGES_PER_GRAPH     # 32
NODE_FEAT_DIM = 8
EDGE_FEAT_DIM = 4
H = 16                            # node_state_dim (== edge encoding dim here)
M = 2 * H                         # message / edge_hidden_sizes[-1]
G = 32                            # graph_rep_dim
PROP_STEPS = 3


def _dot(a, b):
    return jnp.dot(a, b, preferred_element_type=jnp.float32)


def _gmn_kernel(
    node_f_ref, edge_f_ref, g1_ref, g2_ref, scat_ref, pool_ref, sel_ref,
    enc_wn_ref, enc_bn_ref, enc_we_ref, enc_be_ref,
    msg_wf_ref, msg_wt_ref, msg_we_ref, msg_b1_ref, msg_w2_ref, msg_b2_ref,
    gru_wi_ref, gru_bi_ref, gru_wh_ref, gru_bh_ref,
    agg_wgv_ref, agg_bgv_ref, agg_wtr_ref, agg_btr_ref,
    out_ref,
    *, prop_steps, node_dim, graph_dim,
):
    n_nodes = node_f_ref.shape[0]
    n_edges2 = g1_ref.shape[0]              # 2 * n_edges (fwd rows, then rev)
    Hd = node_dim
    Gd = graph_dim
    Md = msg_b1_ref.shape[1]

    # ---------------- GraphEncoder: single Linear on node / edge features ----
    h = _dot(node_f_ref[...], enc_wn_ref[...]) + enc_bn_ref[...]      # (N, H)
    e = _dot(edge_f_ref[...], enc_we_ref[...]) + enc_be_ref[...]      # (E, H)

    # gather / scatter / pool matrices (precomputed in wrapper, f32)
    g1 = g1_ref[...]                                                  # (2E, N)
    g2 = g2_ref[...]                                                  # (2E, N)
    scat = scat_ref[...]                                              # (N, 2E)

    # ---- loop-invariant terms hoisted out of the unrolled prop loop ---------
    # edge-feature contribution + layer-1 bias, stacked for fwd/rev edge rows
    c = _dot(e, msg_we_ref[...]) + msg_b1_ref[...]                    # (E, M)
    cc = jnp.concatenate([c, c], axis=0)                              # (2E, M)
    b2_full = jnp.broadcast_to(msg_b2_ref[...], (n_edges2, Md))       # (2E, M)
    bi_full = jnp.broadcast_to(gru_bi_ref[...], (n_nodes, 3 * Hd))    # (N, 3H)
    bh_full = jnp.broadcast_to(gru_bh_ref[...], (n_nodes, 3 * Hd))    # (N, 3H)

    w_from = msg_wf_ref[...]                                          # (H, M)
    w_to = msg_wt_ref[...]                                            # (H, M)
    w2 = msg_w2_ref[...]                                              # (M, M)
    wi = gru_wi_ref[...]                                              # (M, 3H)
    wh = gru_wh_ref[...]                                              # (H, 3H)

    # ---------------- GraphPropLayer x prop_steps ----------------------------
    for _ in range(prop_steps):
        # node-side projections, shared by forward and reverse messages
        hwf = _dot(h, w_from)                                         # (N, M)
        hwt = _dot(h, w_to)                                           # (N, M)

        # layer-1 pre-activations for forward (rows 0..E-1) and reverse
        # (rows E..2E-1) messages in one stacked tensor:
        #   pre_f = from_oh@(h@Wf) + to_oh@(h@Wt) + e@We + b1
        #   pre_r = to_oh@(h@Wf) + from_oh@(h@Wt) + e@We + b1
        pre = _dot(g1, hwf) + _dot(g2, hwt) + cc                      # (2E, M)

        # shared layer-2 for both directions
        msg = _dot(jnp.maximum(pre, 0.0), w2) + b2_full               # (2E, M)

        # combined unsorted_segment_sum: forward -> to_idx, reverse -> from_idx
        agg = _dot(scat, msg)                                         # (N, M)

        # GRU node update (PyTorch nn.GRU, gate order r, z, n), fused gates
        gi = _dot(agg, wi) + bi_full                                  # (N, 3H)
        gh = _dot(h, wh) + bh_full                                    # (N, 3H)
        r = jax.nn.sigmoid(gi[:, 0:Hd] + gh[:, 0:Hd])
        z = jax.nn.sigmoid(gi[:, Hd:2 * Hd] + gh[:, Hd:2 * Hd])
        n = jnp.tanh(gi[:, 2 * Hd:3 * Hd] + r * gh[:, 2 * Hd:3 * Hd])
        h = (1.0 - z) * n + z * h                                     # (N, H)

    # ---------------- GraphAggregator: gated sum pooling ---------------------
    gv = _dot(h, agg_wgv_ref[...]) + agg_bgv_ref[...]                 # (N, 2G)
    gated = jax.nn.sigmoid(gv[:, 0:Gd]) * gv[:, Gd:2 * Gd]            # (N, G)
    graph_states = _dot(pool_ref[...], gated)                         # (nG, G)
    graph_states = _dot(graph_states, agg_wtr_ref[...]) + agg_btr_ref[...]

    # ---------------- reshape_and_split_tensor(., 2) + hinge score -----------
    # diff = x - y via a single precomputed (+1 even / -1 odd) selection matmul
    diff = _dot(sel_ref[...], graph_states)                           # (B, G)
    out_ref[...] = -jnp.sum(jnp.maximum(diff, 0.0), axis=-1, keepdims=True)


def init_params(key):
    def w(k, shape, scale=0.1):
        return (scale * jax.random.normal(k, shape)).astype(jnp.float32)

    ks = jax.random.split(key, 20)
    return {
        # encoder
        "enc_wn": w(ks[0], (NODE_FEAT_DIM, H)),
        "enc_bn": w(ks[1], (1, H)),
        "enc_we": w(ks[2], (EDGE_FEAT_DIM, H)),
        "enc_be": w(ks[3], (1, H)),
        # message MLP layer 1, split along the concat axis: [from, to, edge]
        "msg_w1": w(ks[4], (3, H, M)),
        "msg_b1": w(ks[5], (1, M)),
        "msg_w2": w(ks[6], (M, M)),
        "msg_b2": w(ks[7], (1, M)),
        # GRU (gate order r, z, n)
        "gru_wi": w(ks[8], (3, M, H)),
        "gru_wh": w(ks[9], (3, H, H)),
        "gru_bi": w(ks[10], (3, 1, H)),
        "gru_bh": w(ks[11], (3, 1, H)),
        # aggregator: gated MLP (gate half / value half of the 2G-wide Linear)
        "agg_wg": w(ks[12], (H, G)),
        "agg_bg": w(ks[13], (1, G)),
        "agg_wv": w(ks[14], (H, G)),
        "agg_bv": w(ks[15], (1, G)),
        # graph transform MLP
        "agg_wt": w(ks[16], (G, G)),
        "agg_bt": w(ks[17], (1, G)),
    }


@functools.partial(jax.jit, static_argnames=("propagation_steps", "n_graphs"))
def gmn_embed_hinge(node_features, edge_features, from_idx, to_idx, graph_idx,
                    params, propagation_steps=PROP_STEPS, n_graphs=N_GRAPHS):
    f32 = jnp.float32
    n_nodes = node_features.shape[0]
    n_edges = edge_features.shape[0]
    n_pairs = n_graphs // 2

    # ---- host/XLA-side precompute: one-hot gather/scatter/pool/selection ----
    from_idx = from_idx.reshape(n_edges).astype(jnp.int32)
    to_idx = to_idx.reshape(n_edges).astype(jnp.int32)
    graph_idx = graph_idx.reshape(n_nodes).astype(jnp.int32)

    node_iota = jnp.arange(n_nodes, dtype=jnp.int32)
    from_oh = (from_idx[:, None] == node_iota[None, :]).astype(f32)   # (E, N)
    to_oh = (to_idx[:, None] == node_iota[None, :]).astype(f32)       # (E, N)
    g1 = jnp.concatenate([from_oh, to_oh], axis=0)                    # (2E, N)
    g2 = jnp.concatenate([to_oh, from_oh], axis=0)                    # (2E, N)
    scat = g2.T                                                       # (N, 2E)
    pool = (jnp.arange(n_graphs, dtype=jnp.int32)[:, None]
            == graph_idx[None, :]).astype(f32)                        # (nG, N)
    rows = jnp.arange(n_pairs, dtype=jnp.int32)[:, None]
    cols = jnp.arange(n_graphs, dtype=jnp.int32)[None, :]
    sel_diff = ((cols == 2 * rows).astype(f32)
                - (cols == 2 * rows + 1).astype(f32))                 # (B, nG)

    # ---- host/XLA-side weight fusion (layout only, exact) -------------------
    msg_wf = params["msg_w1"][0]                                      # (H, M)
    msg_wt = params["msg_w1"][1]                                      # (H, M)
    msg_we = params["msg_w1"][2]                                      # (H, M)
    gru_wi_cat = jnp.concatenate(
        [params["gru_wi"][0], params["gru_wi"][1], params["gru_wi"][2]],
        axis=1)                                                       # (M, 3H)
    gru_wh_cat = jnp.concatenate(
        [params["gru_wh"][0], params["gru_wh"][1], params["gru_wh"][2]],
        axis=1)                                                       # (H, 3H)
    gru_bi_cat = jnp.concatenate(
        [params["gru_bi"][0], params["gru_bi"][1], params["gru_bi"][2]],
        axis=1)                                                       # (1, 3H)
    gru_bh_cat = jnp.concatenate(
        [params["gru_bh"][0], params["gru_bh"][1], params["gru_bh"][2]],
        axis=1)                                                       # (1, 3H)
    agg_wgv = jnp.concatenate([params["agg_wg"], params["agg_wv"]], axis=1)
    agg_bgv = jnp.concatenate([params["agg_bg"], params["agg_bv"]], axis=1)

    args = (
        node_features.astype(f32),
        edge_features.astype(f32),
        g1, g2, scat, pool, sel_diff,
        params["enc_wn"], params["enc_bn"], params["enc_we"], params["enc_be"],
        msg_wf, msg_wt, msg_we, params["msg_b1"],
        params["msg_w2"], params["msg_b2"],
        gru_wi_cat, gru_bi_cat, gru_wh_cat, gru_bh_cat,
        agg_wgv, agg_bgv, params["agg_wt"], params["agg_bt"],
    )

    kernel = functools.partial(_gmn_kernel, prop_steps=propagation_steps,
                               node_dim=H, graph_dim=G)
    vmem = pl.BlockSpec(memory_space=pltpu.MemorySpace.VMEM)
    scores = pl.pallas_call(
        kernel,
        out_shape=jax.ShapeDtypeStruct((n_pairs, 1), jnp.float32),
        in_specs=[vmem] * len(args),
        out_specs=vmem,
    )(*args)
    return scores[:, 0]          # shape (n_pairs,), matches torch output


if __name__ == "__main__":
    key = jax.random.PRNGKey(0)
    k_src, k_dst, k_nf, k_ef, k_par = jax.random.split(key, 5)

    # synthetic batched graphs: N_GRAPHS graphs, intra-graph random edges
    graph_idx = jnp.repeat(jnp.arange(N_GRAPHS, dtype=jnp.int32),
                           NODES_PER_GRAPH)
    src_local = jax.random.randint(k_src, (N_GRAPHS, EDGES_PER_GRAPH),
                                   0, NODES_PER_GRAPH)
    dst_local = jax.random.randint(k_dst, (N_GRAPHS, EDGES_PER_GRAPH),
                                   0, NODES_PER_GRAPH)
    offsets = (jnp.arange(N_GRAPHS, dtype=jnp.int32) * NODES_PER_GRAPH)[:, None]
    from_idx = (src_local + offsets).reshape(-1).astype(jnp.int32)
    to_idx = (dst_local + offsets).reshape(-1).astype(jnp.int32)

    node_features = jax.random.normal(k_nf, (N_NODES, NODE_FEAT_DIM),
                                      jnp.float32)
    edge_features = jax.random.normal(k_ef, (N_EDGES, EDGE_FEAT_DIM),
                                      jnp.float32)
    params = init_params(k_par)

    scores = gmn_embed_hinge(node_features, edge_features, from_idx, to_idx,
                             graph_idx, params)
    jax.block_until_ready(scores)
    assert scores.shape == (N_PAIRS,)
    print("KERNEL_OK")
</pallas_src>

<mosaic_0001>
module attributes {stable_mosaic.version = 11 : i64} {
  func.func @_gmn_kernel(%arg0: memref<16x8xf32, #tpu.memory_space<vmem>>, %arg1: memref<32x4xf32, #tpu.memory_space<vmem>>, %arg2: memref<64x16xf32, #tpu.memory_space<vmem>>, %arg3: memref<64x16xf32, #tpu.memory_space<vmem>>, %arg4: memref<16x64xf32, #tpu.memory_space<vmem>>, %arg5: memref<4x16xf32, #tpu.memory_space<vmem>>, %arg6: memref<2x4xf32, #tpu.memory_space<vmem>>, %arg7: memref<8x16xf32, #tpu.memory_space<vmem>>, %arg8: memref<1x16xf32, #tpu.memory_space<vmem>>, %arg9: memref<4x16xf32, #tpu.memory_space<vmem>>, %arg10: memref<1x16xf32, #tpu.memory_space<vmem>>, %arg11: memref<16x32xf32, #tpu.memory_space<vmem>>, %arg12: memref<16x32xf32, #tpu.memory_space<vmem>>, %arg13: memref<16x32xf32, #tpu.memory_space<vmem>>, %arg14: memref<1x32xf32, #tpu.memory_space<vmem>>, %arg15: memref<32x32xf32, #tpu.memory_space<vmem>>, %arg16: memref<1x32xf32, #tpu.memory_space<vmem>>, %arg17: memref<32x48xf32, #tpu.memory_space<vmem>>, %arg18: memref<1x48xf32, #tpu.memory_space<vmem>>, %arg19: memref<16x48xf32, #tpu.memory_space<vmem>>, %arg20: memref<1x48xf32, #tpu.memory_space<vmem>>, %arg21: memref<16x64xf32, #tpu.memory_space<vmem>>, %arg22: memref<1x64xf32, #tpu.memory_space<vmem>>, %arg23: memref<32x32xf32, #tpu.memory_space<vmem>>, %arg24: memref<1x32xf32, #tpu.memory_space<vmem>>, %arg25: memref<2x1xf32, #tpu.memory_space<vmem>>) attributes {dimension_semantics = [], scalar_prefetch = 0 : i64, scratch_operands = 0 : i64, tpu.core_type = #tpu.core_type<tc>} {
    %c0 = arith.constant 0 : index
    %c0_0 = arith.constant 0 : index
    %0 = vector.load %arg0[%c0, %c0_0] : memref<16x8xf32, #tpu.memory_space<vmem>>, vector<16x8xf32>
    %c0_1 = arith.constant 0 : index
    %c0_2 = arith.constant 0 : index
    %1 = vector.load %arg7[%c0_1, %c0_2] : memref<8x16xf32, #tpu.memory_space<vmem>>, vector<8x16xf32>
    %cst = arith.constant dense<0.000000e+00> : vector<16x16xf32>
    %2 = tpu.matmul %0, %1, %cst {dimension_numbers = #tpu.dot_dimension_numbers<[1], [0], [0], [1], [0, 0, 1, 1], [], []>} : vector<16x8xf32>, vector<8x16xf32>, vector<16x16xf32> -> vector<16x16xf32>
    %c0_3 = arith.constant 0 : index
    %c0_4 = arith.constant 0 : index
    %3 = vector.load %arg8[%c0_3, %c0_4] : memref<1x16xf32, #tpu.memory_space<vmem>>, vector<1x16xf32>
    %4 = vector.broadcast %3 : vector<1x16xf32> to vector<16x16xf32>
    %5 = arith.addf %2, %4 : vector<16x16xf32>
    %c0_5 = arith.constant 0 : index
    %c0_6 = arith.constant 0 : index
    %6 = vector.load %arg1[%c0_5, %c0_6] : memref<32x4xf32, #tpu.memory_space<vmem>>, vector<32x4xf32>
    %c0_7 = arith.constant 0 : index
    %c0_8 = arith.constant 0 : index
    %7 = vector.load %arg9[%c0_7, %c0_8] : memref<4x16xf32, #tpu.memory_space<vmem>>, vector<4x16xf32>
    %cst_9 = arith.constant dense<0.000000e+00> : vector<32x16xf32>
    %8 = tpu.matmul %6, %7, %cst_9 {dimension_numbers = #tpu.dot_dimension_numbers<[1], [0], [0], [1], [0, 0, 1, 1], [], []>} : vector<32x4xf32>, vector<4x16xf32>, vector<32x16xf32> -> vector<32x16xf32>
    %c0_10 = arith.constant 0 : index
    %c0_11 = arith.constant 0 : index
    %9 = vector.load %arg10[%c0_10, %c0_11] : memref<1x16xf32, #tpu.memory_space<vmem>>, vector<1x16xf32>
    %10 = vector.broadcast %9 : vector<1x16xf32> to vector<32x16xf32>
    %11 = arith.addf %8, %10 : vector<32x16xf32>
    %c0_12 = arith.constant 0 : index
    %c0_13 = arith.constant 0 : index
    %12 = vector.load %arg2[%c0_12, %c0_13] : memref<64x16xf32, #tpu.memory_space<vmem>>, vector<64x16xf32>
    %c0_14 = arith.constant 0 : index
    %c0_15 = arith.constant 0 : index
    %13 = vector.load %arg3[%c0_14, %c0_15] : memref<64x16xf32, #tpu.memory_space<vmem>>, vector<64x16xf32>
    %c0_16 = arith.constant 0 : index
    %c0_17 = arith.constant 0 : index
    %14 = vector.load %arg4[%c0_16, %c0_17] : memref<16x64xf32, #tpu.memory_space<vmem>>, vector<16x64xf32>
    %c0_18 = arith.constant 0 : index
    %c0_19 = arith.constant 0 : index
    %15 = vector.load %arg13[%c0_18, %c0_19] : memref<16x32xf32, #tpu.memory_space<vmem>>, vector<16x32xf32>
    %cst_20 = arith.constant dense<0.000000e+00> : vector<32x32xf32>
    %16 = tpu.matmul %11, %15, %cst_20 {dimension_numbers = #tpu.dot_dimension_numbers<[1], [0], [0], [1], [0, 0, 1, 1], [], []>} : vector<32x16xf32>, vector<16x32xf32>, vector<32x32xf32> -> vector<32x32xf32>
    %c0_21 = arith.constant 0 : index
    %c0_22 = arith.constant 0 : index
    %17 = vector.load %arg14[%c0_21, %c0_22] : memref<1x32xf32, #tpu.memory_space<vmem>>, vector<1x32xf32>
    %18 = vector.broadcast %17 : vector<1x32xf32> to vector<32x32xf32>
    %19 = arith.addf %16, %18 : vector<32x32xf32>
    %20 = tpu.concatenate %19, %19 in 0 : vector<32x32xf32>, vector<32x32xf32> -> vector<64x32xf32>
    %c0_23 = arith.constant 0 : index
    %c0_24 = arith.constant 0 : index
    %21 = vector.load %arg16[%c0_23, %c0_24] : memref<1x32xf32, #tpu.memory_space<vmem>>, vector<1x32xf32>
    %22 = vector.shape_cast %21 : vector<1x32xf32> to vector<1x32xf32>
    %23 = vector.broadcast %22 : vector<1x32xf32> to vector<64x32xf32>
    %c0_25 = arith.constant 0 : index
    %c0_26 = arith.constant 0 : index
    %24 = vector.load %arg18[%c0_25, %c0_26] : memref<1x48xf32, #tpu.memory_space<vmem>>, vector<1x48xf32>
    %25 = vector.shape_cast %24 : vector<1x48xf32> to vector<1x48xf32>
    %26 = vector.broadcast %25 : vector<1x48xf32> to vector<16x48xf32>
    %c0_27 = arith.constant 0 : index
    %c0_28 = arith.constant 0 : index
    %27 = vector.load %arg20[%c0_27, %c0_28] : memref<1x48xf32, #tpu.memory_space<vmem>>, vector<1x48xf32>
    %28 = vector.shape_cast %27 : vector<1x48xf32> to vector<1x48xf32>
    %29 = vector.broadcast %28 : vector<1x48xf32> to vector<16x48xf32>
    %c0_29 = arith.constant 0 : index
    %c0_30 = arith.constant 0 : index
    %30 = vector.load %arg11[%c0_29, %c0_30] : memref<16x32xf32, #tpu.memory_space<vmem>>, vector<16x32xf32>
    %c0_31 = arith.constant 0 : index
    %c0_32 = arith.constant 0 : index
    %31 = vector.load %arg12[%c0_31, %c0_32] : memref<16x32xf32, #tpu.memory_space<vmem>>, vector<16x32xf32>
    %c0_33 = arith.constant 0 : index
    %c0_34 = arith.constant 0 : index
    %32 = vector.load %arg15[%c0_33, %c0_34] : memref<32x32xf32, #tpu.memory_space<vmem>>, vector<32x32xf32>
    %c0_35 = arith.constant 0 : index
    %c0_36 = arith.constant 0 : index
    %33 = vector.load %arg17[%c0_35, %c0_36] : memref<32x48xf32, #tpu.memory_space<vmem>>, vector<32x48xf32>
    %c0_37 = arith.constant 0 : index
    %c0_38 = arith.constant 0 : index
    %34 = vector.load %arg19[%c0_37, %c0_38] : memref<16x48xf32, #tpu.memory_space<vmem>>, vector<16x48xf32>
    %cst_39 = arith.constant dense<0.000000e+00> : vector<16x32xf32>
    %35 = tpu.matmul %5, %30, %cst_39 {dimension_numbers = #tpu.dot_dimension_numbers<[1], [0], [0], [1], [0, 0, 1, 1], [], []>} : vector<16x16xf32>, vector<16x32xf32>, vector<16x32xf32> -> vector<16x32xf32>
    %cst_40 = arith.constant dense<0.000000e+00> : vector<16x32xf32>
    %36 = tpu.matmul %5, %31, %cst_40 {dimension_numbers = #tpu.dot_dimension_numbers<[1], [0], [0], [1], [0, 0, 1, 1], [], []>} : vector<16x16xf32>, vector<16x32xf32>, vector<16x32xf32> -> vector<16x32xf32>
    %cst_41 = arith.constant dense<0.000000e+00> : vector<64x32xf32>
    %37 = tpu.matmul %12, %35, %cst_41 {dimension_numbers = #tpu.dot_dimension_numbers<[1], [0], [0], [1], [0, 0, 1, 1], [], []>} : vector<64x16xf32>, vector<16x32xf32>, vector<64x32xf32> -> vector<64x32xf32>
    %cst_42 = arith.constant dense<0.000000e+00> : vector<64x32xf32>
    %38 = tpu.matmul %13, %36, %cst_42 {dimension_numbers = #tpu.dot_dimension_numbers<[1], [0], [0], [1], [0, 0, 1, 1], [], []>} : vector<64x16xf32>, vector<16x32xf32>, vector<64x32xf32> -> vector<64x32xf32>
    %39 = arith.addf %37, %38 : vector<64x32xf32>
    %40 = arith.addf %39, %20 : vector<64x32xf32>
    %cst_43 = arith.constant 0.000000e+00 : f32
    %41 = vector.broadcast %cst_43 : f32 to vector<64x32xf32>
    %42 = arith.maximumf %40, %41 : vector<64x32xf32>
    %cst_44 = arith.constant dense<0.000000e+00> : vector<64x32xf32>
    %43 = tpu.matmul %42, %32, %cst_44 {dimension_numbers = #tpu.dot_dimension_numbers<[1], [0], [0], [1], [0, 0, 1, 1], [], []>} : vector<64x32xf32>, vector<32x32xf32>, vector<64x32xf32> -> vector<64x32xf32>
    %44 = arith.addf %43, %23 : vector<64x32xf32>
    %cst_45 = arith.constant dense<0.000000e+00> : vector<16x32xf32>
    %45 = tpu.matmul %14, %44, %cst_45 {dimension_numbers = #tpu.dot_dimension_numbers<[1], [0], [0], [1], [0, 0, 1, 1], [], []>} : vector<16x64xf32>, vector<64x32xf32>, vector<16x32xf32> -> vector<16x32xf32>
    %cst_46 = arith.constant dense<0.000000e+00> : vector<16x48xf32>
    %46 = tpu.matmul %45, %33, %cst_46 {dimension_numbers = #tpu.dot_dimension_numbers<[1], [0], [0], [1], [0, 0, 1, 1], [], []>} : vector<16x32xf32>, vector<32x48xf32>, vector<16x48xf32> -> vector<16x48xf32>
    %47 = arith.addf %46, %26 : vector<16x48xf32>
    %cst_47 = arith.constant dense<0.000000e+00> : vector<16x48xf32>
    %48 = tpu.matmul %5, %34, %cst_47 {dimension_numbers = #tpu.dot_dimension_numbers<[1], [0], [0], [1], [0, 0, 1, 1], [], []>} : vector<16x16xf32>, vector<16x48xf32>, vector<16x48xf32> -> vector<16x48xf32>
    %49 = arith.addf %48, %29 : vector<16x48xf32>
    %50 = vector.extract_strided_slice %47 {offsets = [0, 0], sizes = [16, 16], strides = [1, 1]} : vector<16x48xf32> to vector<16x16xf32>
    %51 = vector.extract_strided_slice %49 {offsets = [0, 0], sizes = [16, 16], strides = [1, 1]} : vector<16x48xf32> to vector<16x16xf32>
    %52 = arith.addf %50, %51 : vector<16x16xf32>
    %53 = arith.negf %52 : vector<16x16xf32>
    %54 = math.exp %53 : vector<16x16xf32>
    %cst_48 = arith.constant 1.000000e+00 : f32
    %55 = vector.broadcast %cst_48 : f32 to vector<16x16xf32>
    %56 = arith.addf %55, %54 : vector<16x16xf32>
    %57 = arith.divf %55, %56 : vector<16x16xf32>
    %58 = vector.extract_strided_slice %47 {offsets = [0, 16], sizes = [16, 16], strides = [1, 1]} : vector<16x48xf32> to vector<16x16xf32>
    %59 = vector.extract_strided_slice %49 {offsets = [0, 16], sizes = [16, 16], strides = [1, 1]} : vector<16x48xf32> to vector<16x16xf32>
    %60 = arith.addf %58, %59 : vector<16x16xf32>
    %61 = arith.negf %60 : vector<16x16xf32>
    %62 = math.exp %61 : vector<16x16xf32>
    %cst_49 = arith.constant 1.000000e+00 : f32
    %63 = vector.broadcast %cst_49 : f32 to vector<16x16xf32>
    %64 = arith.addf %63, %62 : vector<16x16xf32>
    %65 = arith.divf %63, %64 : vector<16x16xf32>
    %66 = vector.extract_strided_slice %47 {offsets = [0, 32], sizes = [16, 16], strides = [1, 1]} : vector<16x48xf32> to vector<16x16xf32>
    %67 = vector.extract_strided_slice %49 {offsets = [0, 32], sizes = [16, 16], strides = [1, 1]} : vector<16x48xf32> to vector<16x16xf32>
    %68 = arith.mulf %57, %67 : vector<16x16xf32>
    %69 = arith.addf %66, %68 : vector<16x16xf32>
    %70 = math.tanh %69 : vector<16x16xf32>
    %cst_50 = arith.constant 1.000000e+00 : f32
    %71 = vector.broadcast %cst_50 : f32 to vector<16x16xf32>
    %72 = arith.subf %71, %65 : vector<16x16xf32>
    %73 = arith.mulf %72, %70 : vector<16x16xf32>
    %74 = arith.mulf %65, %5 : vector<16x16xf32>
    %75 = arith.addf %73, %74 : vector<16x16xf32>
    %cst_51 = arith.constant dense<0.000000e+00> : vector<16x32xf32>
    %76 = tpu.matmul %75, %30, %cst_51 {dimension_numbers = #tpu.dot_dimension_numbers<[1], [0], [0], [1], [0, 0, 1, 1], [], []>} : vector<16x16xf32>, vector<16x32xf32>, vector<16x32xf32> -> vector<16x32xf32>
    %cst_52 = arith.constant dense<0.000000e+00> : vector<16x32xf32>
    %77 = tpu.matmul %75, %31, %cst_52 {dimension_numbers = #tpu.dot_dimension_numbers<[1], [0], [0], [1], [0, 0, 1, 1], [], []>} : vector<16x16xf32>, vector<16x32xf32>, vector<16x32xf32> -> vector<16x32xf32>
    %cst_53 = arith.constant dense<0.000000e+00> : vector<64x32xf32>
    %78 = tpu.matmul %12, %76, %cst_53 {dimension_numbers = #tpu.dot_dimension_numbers<[1], [0], [0], [1], [0, 0, 1, 1], [], []>} : vector<64x16xf32>, vector<16x32xf32>, vector<64x32xf32> -> vector<64x32xf32>
    %cst_54 = arith.constant dense<0.000000e+00> : vector<64x32xf32>
    %79 = tpu.matmul %13, %77, %cst_54 {dimension_numbers = #tpu.dot_dimension_numbers<[1], [0], [0], [1], [0, 0, 1, 1], [], []>} : vector<64x16xf32>, vector<16x32xf32>, vector<64x32xf32> -> vector<64x32xf32>
    %80 = arith.addf %78, %79 : vector<64x32xf32>
    %81 = arith.addf %80, %20 : vector<64x32xf32>
    %cst_55 = arith.constant 0.000000e+00 : f32
    %82 = vector.broadcast %cst_55 : f32 to vector<64x32xf32>
    %83 = arith.maximumf %81, %82 : vector<64x32xf32>
    %cst_56 = arith.constant dense<0.000000e+00> : vector<64x32xf32>
    %84 = tpu.matmul %83, %32, %cst_56 {dimension_numbers = #tpu.dot_dimension_numbers<[1], [0], [0], [1], [0, 0, 1, 1], [], []>} : vector<64x32xf32>, vector<32x32xf32>, vector<64x32xf32> -> vector<64x32xf32>
    %85 = arith.addf %84, %23 : vector<64x32xf32>
    %cst_57 = arith.constant dense<0.000000e+00> : vector<16x32xf32>
    %86 = tpu.matmul %14, %85, %cst_57 {dimension_numbers = #tpu.dot_dimension_numbers<[1], [0], [0], [1], [0, 0, 1, 1], [], []>} : vector<16x64xf32>, vector<64x32xf32>, vector<16x32xf32> -> vector<16x32xf32>
    %cst_58 = arith.constant dense<0.000000e+00> : vector<16x48xf32>
    %87 = tpu.matmul %86, %33, %cst_58 {dimension_numbers = #tpu.dot_dimension_numbers<[1], [0], [0], [1], [0, 0, 1, 1], [], []>} : vector<16x32xf32>, vector<32x48xf32>, vector<16x48xf32> -> vector<16x48xf32>
    %88 = arith.addf %87, %26 : vector<16x48xf32>
    %cst_59 = arith.constant dense<0.000000e+00> : vector<16x48xf32>
    %89 = tpu.matmul %75, %34, %cst_59 {dimension_numbers = #tpu.dot_dimension_numbers<[1], [0], [0], [1], [0, 0, 1, 1], [], []>} : vector<16x16xf32>, vector<16x48xf32>, vector<16x48xf32> -> vector<16x48xf32>
    %90 = arith.addf %89, %29 : vector<16x48xf32>
    %91 = vector.extract_strided_slice %88 {offsets = [0, 0], sizes = [16, 16], strides = [1, 1]} : vector<16x48xf32> to vector<16x16xf32>
    %92 = vector.extract_strided_slice %90 {offsets = [0, 0], sizes = [16, 16], strides = [1, 1]} : vector<16x48xf32> to vector<16x16xf32>
    %93 = arith.addf %91, %92 : vector<16x16xf32>
    %94 = arith.negf %93 : vector<16x16xf32>
    %95 = math.exp %94 : vector<16x16xf32>
    %cst_60 = arith.constant 1.000000e+00 : f32
    %96 = vector.broadcast %cst_60 : f32 to vector<16x16xf32>
    %97 = arith.addf %96, %95 : vector<16x16xf32>
    %98 = arith.divf %96, %97 : vector<16x16xf32>
    %99 = vector.extract_strided_slice %88 {offsets = [0, 16], sizes = [16, 16], strides = [1, 1]} : vector<16x48xf32> to vector<16x16xf32>
    %100 = vector.extract_strided_slice %90 {offsets = [0, 16], sizes = [16, 16], strides = [1, 1]} : vector<16x48xf32> to vector<16x16xf32>
    %101 = arith.addf %99, %100 : vector<16x16xf32>
    %102 = arith.negf %101 : vector<16x16xf32>
    %103 = math.exp %102 : vector<16x16xf32>
    %cst_61 = arith.constant 1.000000e+00 : f32
    %104 = vector.broadcast %cst_61 : f32 to vector<16x16xf32>
    %105 = arith.addf %104, %103 : vector<16x16xf32>
    %106 = arith.divf %104, %105 : vector<16x16xf32>
    %107 = vector.extract_strided_slice %88 {offsets = [0, 32], sizes = [16, 16], strides = [1, 1]} : vector<16x48xf32> to vector<16x16xf32>
    %108 = vector.extract_strided_slice %90 {offsets = [0, 32], sizes = [16, 16], strides = [1, 1]} : vector<16x48xf32> to vector<16x16xf32>
    %109 = arith.mulf %98, %108 : vector<16x16xf32>
    %110 = arith.addf %107, %109 : vector<16x16xf32>
    %111 = math.tanh %110 : vector<16x16xf32>
    %cst_62 = arith.constant 1.000000e+00 : f32
    %112 = vector.broadcast %cst_62 : f32 to vector<16x16xf32>
    %113 = arith.subf %112, %106 : vector<16x16xf32>
    %114 = arith.mulf %113, %111 : vector<16x16xf32>
    %115 = arith.mulf %106, %75 : vector<16x16xf32>
    %116 = arith.addf %114, %115 : vector<16x16xf32>
    %cst_63 = arith.constant dense<0.000000e+00> : vector<16x32xf32>
    %117 = tpu.matmul %116, %30, %cst_63 {dimension_numbers = #tpu.dot_dimension_numbers<[1], [0], [0], [1], [0, 0, 1, 1], [], []>} : vector<16x16xf32>, vector<16x32xf32>, vector<16x32xf32> -> vector<16x32xf32>
    %cst_64 = arith.constant dense<0.000000e+00> : vector<16x32xf32>
    %118 = tpu.matmul %116, %31, %cst_64 {dimension_numbers = #tpu.dot_dimension_numbers<[1], [0], [0], [1], [0, 0, 1, 1], [], []>} : vector<16x16xf32>, vector<16x32xf32>, vector<16x32xf32> -> vector<16x32xf32>
    %cst_65 = arith.constant dense<0.000000e+00> : vector<64x32xf32>
    %119 = tpu.matmul %12, %117, %cst_65 {dimension_numbers = #tpu.dot_dimension_numbers<[1], [0], [0], [1], [0, 0, 1, 1], [], []>} : vector<64x16xf32>, vector<16x32xf32>, vector<64x32xf32> -> vector<64x32xf32>
    %cst_66 = arith.constant dense<0.000000e+00> : vector<64x32xf32>
    %120 = tpu.matmul %13, %118, %cst_66 {dimension_numbers = #tpu.dot_dimension_numbers<[1], [0], [0], [1], [0, 0, 1, 1], [], []>} : vector<64x16xf32>, vector<16x32xf32>, vector<64x32xf32> -> vector<64x32xf32>
    %121 = arith.addf %119, %120 : vector<64x32xf32>
    %122 = arith.addf %121, %20 : vector<64x32xf32>
    %cst_67 = arith.constant 0.000000e+00 : f32
    %123 = vector.broadcast %cst_67 : f32 to vector<64x32xf32>
    %124 = arith.maximumf %122, %123 : vector<64x32xf32>
    %cst_68 = arith.constant dense<0.000000e+00> : vector<64x32xf32>
    %125 = tpu.matmul %124, %32, %cst_68 {dimension_numbers = #tpu.dot_dimension_numbers<[1], [0], [0], [1], [0, 0, 1, 1], [], []>} : vector<64x32xf32>, vector<32x32xf32>, vector<64x32xf32> -> vector<64x32xf32>
    %126 = arith.addf %125, %23 : vector<64x32xf32>
    %cst_69 = arith.constant dense<0.000000e+00> : vector<16x32xf32>
    %127 = tpu.matmul %14, %126, %cst_69 {dimension_numbers = #tpu.dot_dimension_numbers<[1], [0], [0], [1], [0, 0, 1, 1], [], []>} : vector<16x64xf32>, vector<64x32xf32>, vector<16x32xf32> -> vector<16x32xf32>
    %cst_70 = arith.constant dense<0.000000e+00> : vector<16x48xf32>
    %128 = tpu.matmul %127, %33, %cst_70 {dimension_numbers = #tpu.dot_dimension_numbers<[1], [0], [0], [1], [0, 0, 1, 1], [], []>} : vector<16x32xf32>, vector<32x48xf32>, vector<16x48xf32> -> vector<16x48xf32>
    %129 = arith.addf %128, %26 : vector<16x48xf32>
    %cst_71 = arith.constant dense<0.000000e+00> : vector<16x48xf32>
    %130 = tpu.matmul %116, %34, %cst_71 {dimension_numbers = #tpu.dot_dimension_numbers<[1], [0], [0], [1], [0, 0, 1, 1], [], []>} : vector<16x16xf32>, vector<16x48xf32>, vector<16x48xf32> -> vector<16x48xf32>
    %131 = arith.addf %130, %29 : vector<16x48xf32>
    %132 = vector.extract_strided_slice %129 {offsets = [0, 0], sizes = [16, 16], strides = [1, 1]} : vector<16x48xf32> to vector<16x16xf32>
    %133 = vector.extract_strided_slice %131 {offsets = [0, 0], sizes = [16, 16], strides = [1, 1]} : vector<16x48xf32> to vector<16x16xf32>
    %134 = arith.addf %132, %133 : vector<16x16xf32>
    %135 = arith.negf %134 : vector<16x16xf32>
    %136 = math.exp %135 : vector<16x16xf32>
    %cst_72 = arith.constant 1.000000e+00 : f32
    %137 = vector.broadcast %cst_72 : f32 to vector<16x16xf32>
    %138 = arith.addf %137, %136 : vector<16x16xf32>
    %139 = arith.divf %137, %138 : vector<16x16xf32>
    %140 = vector.extract_strided_slice %129 {offsets = [0, 16], sizes = [16, 16], strides = [1, 1]} : vector<16x48xf32> to vector<16x16xf32>
    %141 = vector.extract_strided_slice %131 {offsets = [0, 16], sizes = [16, 16], strides = [1, 1]} : vector<16x48xf32> to vector<16x16xf32>
    %142 = arith.addf %140, %141 : vector<16x16xf32>
    %143 = arith.negf %142 : vector<16x16xf32>
    %144 = math.exp %143 : vector<16x16xf32>
    %cst_73 = arith.constant 1.000000e+00 : f32
    %145 = vector.broadcast %cst_73 : f32 to vector<16x16xf32>
    %146 = arith.addf %145, %144 : vector<16x16xf32>
    %147 = arith.divf %145, %146 : vector<16x16xf32>
    %148 = vector.extract_strided_slice %129 {offsets = [0, 32], sizes = [16, 16], strides = [1, 1]} : vector<16x48xf32> to vector<16x16xf32>
    %149 = vector.extract_strided_slice %131 {offsets = [0, 32], sizes = [16, 16], strides = [1, 1]} : vector<16x48xf32> to vector<16x16xf32>
    %150 = arith.mulf %139, %149 : vector<16x16xf32>
    %151 = arith.addf %148, %150 : vector<16x16xf32>
    %152 = math.tanh %151 : vector<16x16xf32>
    %cst_74 = arith.constant 1.000000e+00 : f32
    %153 = vector.broadcast %cst_74 : f32 to vector<16x16xf32>
    %154 = arith.subf %153, %147 : vector<16x16xf32>
    %155 = arith.mulf %154, %152 : vector<16x16xf32>
    %156 = arith.mulf %147, %116 : vector<16x16xf32>
    %157 = arith.addf %155, %156 : vector<16x16xf32>
    %c0_75 = arith.constant 0 : index
    %c0_76 = arith.constant 0 : index
    %158 = vector.load %arg21[%c0_75, %c0_76] : memref<16x64xf32, #tpu.memory_space<vmem>>, vector<16x64xf32>
    %cst_77 = arith.constant dense<0.000000e+00> : vector<16x64xf32>
    %159 = tpu.matmul %157, %158, %cst_77 {dimension_numbers = #tpu.dot_dimension_numbers<[1], [0], [0], [1], [0, 0, 1, 1], [], []>} : vector<16x16xf32>, vector<16x64xf32>, vector<16x64xf32> -> vector<16x64xf32>
    %c0_78 = arith.constant 0 : index
    %c0_79 = arith.constant 0 : index
    %160 = vector.load %arg22[%c0_78, %c0_79] : memref<1x64xf32, #tpu.memory_space<vmem>>, vector<1x64xf32>
    %161 = vector.broadcast %160 : vector<1x64xf32> to vector<16x64xf32>
    %162 = arith.addf %159, %161 : vector<16x64xf32>
    %163 = vector.extract_strided_slice %162 {offsets = [0, 0], sizes = [16, 32], strides = [1, 1]} : vector<16x64xf32> to vector<16x32xf32>
    %164 = arith.negf %163 : vector<16x32xf32>
    %165 = math.exp %164 : vector<16x32xf32>
    %cst_80 = arith.constant 1.000000e+00 : f32
    %166 = vector.broadcast %cst_80 : f32 to vector<16x32xf32>
    %167 = arith.addf %166, %165 : vector<16x32xf32>
    %168 = arith.divf %166, %167 : vector<16x32xf32>
    %169 = vector.extract_strided_slice %162 {offsets = [0, 32], sizes = [16, 32], strides = [1, 1]} : vector<16x64xf32> to vector<16x32xf32>
    %170 = arith.mulf %168, %169 : vector<16x32xf32>
    %c0_81 = arith.constant 0 : index
    %c0_82 = arith.constant 0 : index
    %171 = vector.load %arg5[%c0_81, %c0_82] : memref<4x16xf32, #tpu.memory_space<vmem>>, vector<4x16xf32>
    %cst_83 = arith.constant dense<0.000000e+00> : vector<4x32xf32>
    %172 = tpu.matmul %171, %170, %cst_83 {dimension_numbers = #tpu.dot_dimension_numbers<[1], [0], [0], [1], [0, 0, 1, 1], [], []>} : vector<4x16xf32>, vector<16x32xf32>, vector<4x32xf32> -> vector<4x32xf32>
    %c0_84 = arith.constant 0 : index
    %c0_85 = arith.constant 0 : index
    %173 = vector.load %arg23[%c0_84, %c0_85] : memref<32x32xf32, #tpu.memory_space<vmem>>, vector<32x32xf32>
    %cst_86 = arith.constant dense<0.000000e+00> : vector<4x32xf32>
    %174 = tpu.matmul %172, %173, %cst_86 {dimension_numbers = #tpu.dot_dimension_numbers<[1], [0], [0], [1], [0, 0, 1, 1], [], []>} : vector<4x32xf32>, vector<32x32xf32>, vector<4x32xf32> -> vector<4x32xf32>
    %c0_87 = arith.constant 0 : index
    %c0_88 = arith.constant 0 : index
    %175 = vector.load %arg24[%c0_87, %c0_88] : memref<1x32xf32, #tpu.memory_space<vmem>>, vector<1x32xf32>
    %176 = vector.broadcast %175 : vector<1x32xf32> to vector<4x32xf32>
    %177 = arith.addf %174, %176 : vector<4x32xf32>
    %c0_89 = arith.constant 0 : index
    %c0_90 = arith.constant 0 : index
    %178 = vector.load %arg6[%c0_89, %c0_90] : memref<2x4xf32, #tpu.memory_space<vmem>>, vector<2x4xf32>
    %cst_91 = arith.constant dense<0.000000e+00> : vector<2x32xf32>
    %179 = tpu.matmul %178, %177, %cst_91 {dimension_numbers = #tpu.dot_dimension_numbers<[1], [0], [0], [1], [0, 0, 1, 1], [], []>} : vector<2x4xf32>, vector<4x32xf32>, vector<2x32xf32> -> vector<2x32xf32>
    %cst_92 = arith.constant 0.000000e+00 : f32
    %180 = vector.broadcast %cst_92 : f32 to vector<2x32xf32>
    %181 = arith.maximumf %179, %180 : vector<2x32xf32>
    %cst_93 = arith.constant dense<0.000000e+00> : vector<2xf32>
    %182 = vector.multi_reduction <add>, %181, %cst_93 [1] : vector<2x32xf32> to vector<2xf32>
    %183 = vector.shape_cast %182 : vector<2xf32> to vector<2x1xf32>
    %cst_94 = arith.constant 0.000000e+00 : f32
    %184 = vector.broadcast %cst_94 : f32 to vector<2x1xf32>
    %185 = arith.subf %184, %183 : vector<2x1xf32>
    %c0_95 = arith.constant 0 : index
    %c0_96 = arith.constant 0 : index
    %186 = vector.load %arg25[%c0_95, %c0_96] : memref<2x1xf32, #tpu.memory_space<vmem>>, vector<2x1xf32>
    tpu.vector_store %arg25[%c0_95, %c0_96], %185 {strides = array<i32>} : memref<2x1xf32, #tpu.memory_space<vmem>>, vector<2x1xf32>,
    return
  }
}

</mosaic_0001>

<bundles_post_ra>
// kernel: gmn_embed_hinge.1
= control target key start
LH: loop header
LB: loop body
LE: loop exit
PB: predicated region body
PF: predicated region fallthrough
CT: control target
= control target key end

     0   :  { %vm87_vm0 = vcmask 64512   ;;  %vm139_vm1 = vcmask 1043456   ;;  %vm126_vm2 = vcmask 31744   ;;  %vm196_vm3 = vcmask 130048   ;;  %s2538_s7 = inlined_call_operand.vmem [shape: f32[8,16], index: 7, kind: input, shape index: {}]   ;;  %s2539_s0 = inlined_call_operand.vmem [shape: f32[16,8], index: 0, kind: input, shape index: {}]   ;;  %s2540_s8 = inlined_call_operand.vmem [shape: f32[1,16], index: 8, kind: input, shape index: {}]   ;;  %s2541_s11 = inlined_call_operand.vmem [shape: f32[16,32], index: 11, kind: input, shape index: {}]   ;;  %s2542_s12 = inlined_call_operand.vmem [shape: f32[16,32], index: 12, kind: input, shape index: {}]   ;;  %s2543_s9 = inlined_call_operand.vmem [shape: f32[4,16], index: 9, kind: input, shape index: {}]   ;;  %s2544_s1 = inlined_call_operand.vmem [shape: f32[32,4], index: 1, kind: input, shape index: {}]   ;;  %s2545_s10 = inlined_call_operand.vmem [shape: f32[1,16], index: 10, kind: input, shape index: {}]   ;;  %s2546_s14 = inlined_call_operand.vmem [shape: f32[1,32], index: 14, kind: input, shape index: {}]   ;;  %s2547_s13 = inlined_call_operand.vmem [shape: f32[16,32], index: 13, kind: input, shape index: {}]   ;;  %s2548_s3 = inlined_call_operand.vmem [shape: f32[64,16], index: 3, kind: input, shape index: {}]   ;;  %s2549_s2 = inlined_call_operand.vmem [shape: f32[64,16], index: 2, kind: input, shape index: {}]   ;;  %s2550_s15 = inlined_call_operand.vmem [shape: f32[32,32], index: 15, kind: input, shape index: {}]   ;;  %s2551_s16 = inlined_call_operand.vmem [shape: f32[1,32], index: 16, kind: input, shape index: {}]   ;;  %s2552_s4 = inlined_call_operand.vmem [shape: f32[16,64], index: 4, kind: input, shape index: {}]   ;;  %s2553_s17 = inlined_call_operand.vmem [shape: f32[32,48], index: 17, kind: input, shape index: {}]   ;;  %s2554_s18 = inlined_call_operand.vmem [shape: f32[1,48], index: 18, kind: input, shape index: {}]   ;;  %s2555_s19 = inlined_call_operand.vmem [shape: f32[16,48], index: 19, kind: input, shape index: {}]   ;;  %s2556_s20 = inlined_call_operand.vmem [shape: f32[1,48], index: 20, kind: input, shape index: {}]   ;;  %s2557_s21 = inlined_call_operand.vmem [shape: f32[16,64], index: 21, kind: input, shape index: {}]   ;;  %s2558_s22 = inlined_call_operand.vmem [shape: f32[1,64], index: 22, kind: input, shape index: {}]   ;;  %s2559_s23 = inlined_call_operand.vmem [shape: f32[32,32], index: 23, kind: input, shape index: {}]   ;;  %s2560_s5 = inlined_call_operand.vmem [shape: f32[4,16], index: 5, kind: input, shape index: {}]   ;;  %s2561_s24 = inlined_call_operand.vmem [shape: f32[1,32], index: 24, kind: input, shape index: {}]   ;;  %s2562_s6 = inlined_call_operand.vmem [shape: f32[2,4], index: 6, kind: input, shape index: {}]   ;;  %s2563_s25 = inlined_call_operand.vmem [shape: f32[2,1], index: 25, kind: output, shape index: {}]  }
   0x1   :  { %2569 = sst [smem:[#allocation2_spill]] %s2538_s7  ;;  %v2020_v31 = vld [vmem:[%s2548_s3] sm:$0xff]  ;;  %v2034_v34 = vld [vmem:[%s2548_s3 + $0x8] sm:$0xff]  ;;  %v2048_v36 = vld [vmem:[%s2548_s3 + $0x10] sm:$0xff]  ;;  %vm462_vm4 = vcmask 261120   ;;  %vm528_vm5 = vcmask 523264  }
   0x2   :  { %2570 = sst [smem:[#allocation3_spill]] %s2539_s0  ;;  %v2028_v33 = vld [vmem:[%s2549_s2] sm:$0xff]  ;;  %v2043_v35 = vld [vmem:[%s2549_s2 + $0x8] sm:$0xff]  ;;  %v2057_v37 = vld [vmem:[%s2549_s2 + $0x10] sm:$0xff]  ;;  %s1805_s0 = smov 112  }
   0x3   :  { %2571 = sst [smem:[#allocation4_spill]] %s2540_s8  ;;  %v2062_v38 = vld [vmem:[%s2548_s3 + $0x18] sm:$0xff]  ;;  %v2076_v40 = vld [vmem:[%s2548_s3 + $0x20] sm:$0xff]  ;;  %v2090_v42 = vld [vmem:[%s2548_s3 + $0x28] sm:$0xff] }
   0x4   :  { %2572 = sst [smem:[#allocation5_spill]] %s2541_s11  ;;  %v2071_v39 = vld [vmem:[%s2549_s2 + $0x18] sm:$0xff]  ;;  %v2085_v41 = vld [vmem:[%s2549_s2 + $0x20] sm:$0xff]  ;;  %v2099_v43 = vld [vmem:[%s2549_s2 + $0x28] sm:$0xff] }
   0x5   :  { %2573 = sst [smem:[#allocation6_spill]] %s2542_s12  ;;  %v2104_v44 = vld [vmem:[%s2548_s3 + $0x30] sm:$0xff]  ;;  %v2118_v46 = vld [vmem:[%s2548_s3 + $0x38] sm:$0xff]  ;;  %v2146_v50 = vld [vmem:[%s2550_s15 + $0x8] sm:$0xff] }
   0x6   :  { %2574 = sst [smem:[#allocation7_spill]] %s2543_s9  ;;  %v2113_v45 = vld [vmem:[%s2549_s2 + $0x30] sm:$0xff]  ;;  %v2127_v47 = vld [vmem:[%s2549_s2 + $0x38] sm:$0xff]  ;;  %v2152_v51 = vld [vmem:[%s2550_s15] sm:$0xff] }
   0x7   :  { %2575 = sst [smem:[#allocation8_spill]] %s2544_s1  ;;  %v2134_v48 = vld [vmem:[%s2550_s15 + $0x18] sm:$0xff]  ;;  %v2140_v49 = vld [vmem:[%s2550_s15 + $0x10] sm:$0xff] }
   0x8   :  { %2576 = sst [smem:[#allocation9_spill]] %s2545_s10 }
   0x9   :  { %2577 = sst [smem:[#allocation10_spill]] %s2546_s14 }
   0xa   :  { %2578 = sst [smem:[#allocation11_spill]] %s2547_s13 }
   0xb   :  { %s2579_s8 = sld [smem:[#allocation2_spill]] }
   0xc   :  { %s2580_s11 = sld [smem:[#allocation3_spill]] }
   0xd   :  { %s2581_s12 = sld [smem:[#allocation5_spill]] }
   0xe   :  { %s2582_s9 = sld [smem:[#allocation6_spill]] }
   0xf   :  { %s2584_s14 = sld [smem:[#allocation8_spill]] }
  0x10   :  { %s2585_s1 = sld [smem:[#allocation4_spill]] }
  0x11   :  { %v82_v0 = vld [vmem:[%s2579_s8] sm:$0xff]  ;;  %s2588_s26 = sld [smem:[#allocation10_spill]] }
  0x12   :  { %v80_v1 = vld [vmem:[%s2580_s11] sm:$0xff]  ;;  %109 = vmatpush.msra.mxu0 %v82_v0  ;;  %v81_v2 = vld [vmem:[%s2580_s11 + $0x8] sm:$0xff]  ;;  %s2583_s11 = sld [smem:[#allocation7_spill]] }
  0x13   :  { %1619 = vmatmul.msk.f32.vlgmr.msra.gmra.mxu0 %vm87_vm0, %v80_v1  ;;  %v1948_v3 = vld [vmem:[%s2581_s12 + $0x8] sm:$0xff]  ;;  %v1960_v5 = vld [vmem:[%s2581_s12] sm:$0xff] }
  0x14   :  { %v1953_v4 = vld [vmem:[%s2582_s9 + $0x8] sm:$0xff]  ;;  %284 = vmatpush.msra.mxu3 %v1948_v3  ;;  %v1965_v6 = vld [vmem:[%s2582_s9] sm:$0xff] }
  0x15   :  { %307 = vmatpush.msrb.mxu0 %v1953_v4  ;;  %v117_v8 = vld [vmem:[%s2584_s14] sm:$0xff]  ;;  %v118_v9 = vld [vmem:[%s2584_s14 + $0x8] sm:$0xff]  ;;  %v119_v10 = vld [vmem:[%s2584_s14 + $0x10] sm:$0xff] }
  0x16   :  { %285 = vmatpush.msra.mxu3 %v1960_v5  ;;  %v1750_v11 = vld [vmem:[%s2585_s1] ss:$0 sm:$0xff]  ;;  %v120_v14 = vld [vmem:[%s2584_s14 + $0x18] sm:$0xff]  ;;  %s2587_s14 = sld [smem:[#allocation11_spill]] }
  0x17   :  { %308 = vmatpush.msrb.mxu0 %v1965_v6  ;;  %v1752_v53 = vld [vmem:[%s2588_s26] ss:$0 sm:$0xff] }
  0x18   :  { %v121_v7 = vld [vmem:[%s2583_s11] sm:$0xf]  ;;  %s2586_s11 = sld [smem:[#allocation9_spill]] }
  0x19   :  { %1621 = vmatpush.msk.msra.mxu1 %vm139_vm1, %v121_v7 }
  0x1a   :  { %1622 = vmatmul.msk.f32.vlgmr.msra.gmra.mxu1 %vm126_vm2, %v117_v8 }
  0x1b   :  { %1620 = vmatmul.msk.f32.gmra.mxu0 %vm87_vm0, %v81_v2  ;;  %499 = vmatpush.msrb.mxu1 %v2134_v48 }
  0x1c   :  { %v191_v18 = vld [vmem:[%s2587_s14 + $0x8] sm:$0xff]  ;;  %v190_v20 = vld [vmem:[%s2587_s14] sm:$0xff] }
  0x1d   :  { %223 = vmatpush.msra.mxu2 %v191_v18  ;;  %500 = vmatpush.msrb.mxu1 %v2140_v49 }
  0x1e   :  { %v1751_v17 = vld [vmem:[%s2586_s11] ss:$0 sm:$0xff]  ;;  %s1802_s11 = smov 96  }
  0x1f   :  { %224 = vmatpush.msra.mxu2 %v190_v20  ;;  %501 = vmatpush.msrb.mxu1 %v2146_v50 }
  0x21   :  { %502 = vmatpush.msrb.mxu1 %v2152_v51 }
  0x22   :  { %1623 = vmatmul.msk.f32.gmra.mxu1 %vm126_vm2, %v118_v9 }
  0x2a   :  { %1624 = vmatmul.msk.f32.gmra.mxu1 %vm126_vm2, %v119_v10 }
  0x32   :  { %1625 = vmatmul.msk.f32.gmra.mxu1 %vm126_vm2, %v120_v14 }
  0x90   :  { %v111_v12 = vpop.f32.mrf.mxu0 }
  0x91   :  { %v1988_v13 = vadd.f32 %v1750_v11, %v111_v12 }
  0x93   :  { %1630 = vmatmul.msk.f32.vlgmr.msra.gmra.mxu3 %vm196_vm3, %v1988_v13  ;;  %1632 = vmatmul.msk.f32.vlgmr.msrb.gmra.mxu0 %vm196_vm3, %v1988_v13 }
  0x97   :  { %v160_v19 = vpop.f32.mrf.mxu1 }
  0x98   :  { %v114_v15 = vpop.f32.mrf.mxu0  ;;  %v161_v21 = vadd.f32 %v1751_v17, %v160_v19 }
  0x99   :  { %v1998_v16 = vadd.f32 %v1750_v11, %v114_v15 }
  0x9a   :  { %1626 = vmatmul.msk.f32.vlgmr.msra.gmra.mxu2 %vm196_vm3, %v161_v21 }
  0x9b   :  { %1631 = vmatmul.msk.f32.gmra.mxu3 %vm196_vm3, %v1998_v16  ;;  %1633 = vmatmul.msk.f32.gmra.mxu0 %vm196_vm3, %v1998_v16 }
  0x9f   :  { %v163_v22 = vpop.f32.mrf.mxu1 }
  0xa0   :  { %v164_v23 = vadd.f32 %v1751_v17, %v163_v22 }
  0xa2   :  { %1627 = vmatmul.msk.f32.gmra.mxu2 %vm196_vm3, %v164_v23 }
  0xa7   :  { %v166_v24 = vpop.f32.mrf.mxu1 }
  0xa8   :  { %v167_v25 = vadd.f32 %v1751_v17, %v166_v24 }
  0xaa   :  { %1628 = vmatmul.msk.f32.gmra.mxu2 %vm196_vm3, %v167_v25 }
  0xaf   :  { %v169_v27 = vpop.f32.mrf.mxu1 }
  0xb0   :  { %v170_v28 = vadd.f32 %v1751_v17, %v169_v27 }
  0xb2   :  { %1629 = vmatmul.msk.f32.gmra.mxu2 %vm196_vm3, %v170_v28 }
 0x110   :  { %v310_v26 = vpop.f32.mrf.mxu0 }
 0x116   :  { %v287_v29 = vpop.f32.mrf.mxu3 }
 0x118   :  { %v313_v30 = vpop.f32.mrf.mxu0 }
 0x119   :  { %354 = vmatpush.msrb.mxu3 %v313_v30 }
 0x11b   :  { %355 = vmatpush.msrb.mxu3 %v310_v26 }
 0x11c   :  { %1634 = vmatmul.msk.f32.vlgmr.msrb.gmra.mxu3 %vm196_vm3, %v2020_v31 }
 0x11d   :  { %741 = vmatpush.msra.mxu3 %v1953_v4  ;;  %v226_v52 = vpop.f32.mrf.mxu2 }
 0x11e   :  { %v290_v32 = vpop.f32.mrf.mxu3  ;;  %v2158_v54 = vadd.f32 %v1752_v53, %v226_v52 }
 0x11f   :  { %419 = vmatpush.msra.mxu0 %v290_v32  ;;  %742 = vmatpush.msra.mxu3 %v1965_v6 }
 0x121   :  { %420 = vmatpush.msra.mxu0 %v287_v29 }
 0x122   :  { %1642 = vmatmul.msk.f32.vlgmr.msra.gmra.mxu0 %vm196_vm3, %v2028_v33 }
 0x124   :  { %1635 = vmatmul.msk.f32.gmra.mxu3 %vm196_vm3, %v2034_v34 }
 0x125   :  { %v229_v55 = vpop.f32.mrf.mxu2 }
 0x126   :  { %v2162_v61 = vadd.f32 %v1752_v53, %v229_v55 }
 0x12a   :  { %1643 = vmatmul.msk.f32.gmra.mxu0 %vm196_vm3, %v2043_v35 }
 0x12c   :  { %1636 = vmatmul.msk.f32.gmra.mxu3 %vm196_vm3, %v2048_v36 }
 0x12d   :  { %v232_v1 = vpop.f32.mrf.mxu2 }
 0x12e   :  { %v2166_v8 = vadd.f32 %v1752_v53, %v232_v1 }
 0x132   :  { %1644 = vmatmul.msk.f32.gmra.mxu0 %vm196_vm3, %v2057_v37 }
 0x134   :  { %1637 = vmatmul.msk.f32.gmra.mxu3 %vm196_vm3, %v2062_v38 }
 0x135   :  { %v235_v14 = vpop.f32.mrf.mxu2 }
 0x136   :  { %v2170_v17 = vadd.f32 %v1752_v53, %v235_v14  ;;  %v2185_v14 = vld [vmem:[%s2551_s16] ss:$0 sm:$0xff] }
 0x13a   :  { %1645 = vmatmul.msk.f32.gmra.mxu0 %vm196_vm3, %v2071_v39 }
 0x13c   :  { %1638 = vmatmul.msk.f32.gmra.mxu3 %vm196_vm3, %v2076_v40 }
 0x142   :  { %1646 = vmatmul.msk.f32.gmra.mxu0 %vm196_vm3, %v2085_v41 }
 0x144   :  { %1639 = vmatmul.msk.f32.gmra.mxu3 %vm196_vm3, %v2090_v42 }
 0x14a   :  { %1647 = vmatmul.msk.f32.gmra.mxu0 %vm196_vm3, %v2099_v43 }
 0x14c   :  { %1640 = vmatmul.msk.f32.gmra.mxu3 %vm196_vm3, %v2104_v44 }
 0x152   :  { %1648 = vmatmul.msk.f32.gmra.mxu0 %vm196_vm3, %v2113_v45 }
 0x154   :  { %1641 = vmatmul.msk.f32.gmra.mxu3 %vm196_vm3, %v2118_v46 }
 0x15a   :  { %1649 = vmatmul.msk.f32.gmra.mxu0 %vm196_vm3, %v2127_v47 }
 0x19f   :  { %v357_v56 = vpop.f32.mrf.mxu3  ;;  %v422_v57 = vpop.f32.mrf.mxu0 }
 0x1a0   :  { %v423_v58 = vadd.f32 %v422_v57, %v357_v56 }
 0x1a2   :  { %v446_v59 = vadd.f32 %v423_v58, %v2158_v54 }
 0x1a4   :  { %v454_v60 = vmax.f32 %v446_v59, 0.0 }
 0x1a6   :  { %1650 = vmatmul.msk.f32.vlgmr.msrb.gmra.mxu1 %vm462_vm4, %v454_v60 }
 0x1a7   :  { %v360_v62 = vpop.f32.mrf.mxu3  ;;  %v425_v63 = vpop.f32.mrf.mxu0 }
 0x1a8   :  { %v426_v0 = vadd.f32 %v425_v63, %v360_v62 }
 0x1aa   :  { %v447_v2 = vadd.f32 %v426_v0, %v2162_v61 }
 0x1ac   :  { %v455_v7 = vmax.f32 %v447_v2, 0.0 }
 0x1ae   :  { %1651 = vmatmul.msk.f32.gmra.mxu1 %vm462_vm4, %v455_v7 }
 0x1af   :  { %v363_v9 = vpop.f32.mrf.mxu3  ;;  %v428_v10 = vpop.f32.mrf.mxu0 }
 0x1b0   :  { %v429_v11 = vadd.f32 %v428_v10, %v363_v9 }
 0x1b2   :  { %v448_v12 = vadd.f32 %v429_v11, %v2166_v8 }
 0x1b4   :  { %v456_v15 = vmax.f32 %v448_v12, 0.0 }
 0x1b6   :  { %1652 = vmatmul.msk.f32.gmra.mxu1 %vm462_vm4, %v456_v15 }
 0x1b7   :  { %v366_v18 = vpop.f32.mrf.mxu3  ;;  %v431_v19 = vpop.f32.mrf.mxu0 }
 0x1b8   :  { %v432_v20 = vadd.f32 %v431_v19, %v366_v18 }
 0x1ba   :  { %v449_v21 = vadd.f32 %v432_v20, %v2170_v17 }
 0x1bc   :  { %v457_v22 = vmax.f32 %v449_v21, 0.0 }
 0x1be   :  { %1653 = vmatmul.msk.f32.gmra.mxu1 %vm462_vm4, %v457_v22 }
 0x1bf   :  { %v369_v23 = vpop.f32.mrf.mxu3  ;;  %v434_v24 = vpop.f32.mrf.mxu0 }
 0x1c0   :  { %v435_v25 = vadd.f32 %v434_v24, %v369_v23 }
 0x1c2   :  { %v450_v26 = vadd.f32 %v435_v25, %v2158_v54 }
 0x1c4   :  { %v458_v27 = vmax.f32 %v450_v26, 0.0  ;;  %v2198_v26 = vld [vmem:[%s2552_s4] sm:$0xff] }
 0x1c6   :  { %1654 = vmatmul.msk.f32.gmra.mxu1 %vm462_vm4, %v458_v27  ;;  %v2203_v27 = vld [vmem:[%s2553_s17 + $0x18] sm:$0xff] }
 0x1c7   :  { %v372_v28 = vpop.f32.mrf.mxu3  ;;  %v437_v29 = vpop.f32.mrf.mxu0 }
 0x1c8   :  { %v438_v30 = vadd.f32 %v437_v29, %v372_v28  ;;  %v2210_v28 = vld [vmem:[%s2553_s17 + $0x10] sm:$0xff]  ;;  %v2216_v29 = vld [vmem:[%s2553_s17 + $0x8] sm:$0xff] }
 0x1ca   :  { %v451_v32 = vadd.f32 %v438_v30, %v2162_v61  ;;  %v2222_v30 = vld [vmem:[%s2552_s4 + $0x8] sm:$0xff] }
 0x1cc   :  { %v459_v52 = vmax.f32 %v451_v32, 0.0  ;;  %v2230_v32 = vld [vmem:[%s2553_s17] sm:$0xff] }
 0x1ce   :  { %1655 = vmatmul.msk.f32.gmra.mxu1 %vm462_vm4, %v459_v52  ;;  %v2236_v52 = vld [vmem:[%s2555_s19 + $0x8] sm:$0xff] }
 0x1cf   :  { %v375_v53 = vpop.f32.mrf.mxu3  ;;  %v440_v55 = vpop.f32.mrf.mxu0 }
 0x1d0   :  { %v441_v56 = vadd.f32 %v440_v55, %v375_v53  ;;  %v2241_v53 = vld [vmem:[%s2555_s19] sm:$0xff] }
 0x1d2   :  { %v452_v57 = vadd.f32 %v441_v56, %v2166_v8 }
 0x1d4   :  { %v460_v58 = vmax.f32 %v452_v57, 0.0 }
 0x1d6   :  { %1656 = vmatmul.msk.f32.gmra.mxu1 %vm462_vm4, %v460_v58 }
 0x1d7   :  { %v378_v59 = vpop.f32.mrf.mxu3  ;;  %v443_v60 = vpop.f32.mrf.mxu0 }
 0x1d8   :  { %v444_v62 = vadd.f32 %v443_v60, %v378_v59  ;;  %v2260_v59 = vld [vmem:[%s2556_s20] ss:$0 sm:$0xff]  ;;  %s1804_s20 = smov 16  }
 0x1da   :  { %v453_v63 = vadd.f32 %v444_v62, %v2170_v17 }
 0x1dc   :  { %v461_v0 = vmax.f32 %v453_v63, 0.0 }
 0x1de   :  { %1657 = vmatmul.msk.f32.gmra.mxu1 %vm462_vm4, %v461_v0 }
 0x223   :  { %v504_v1 = vpop.f32.mrf.mxu1 }
 0x224   :  { %v505_v25 = vadd.f32 %v2185_v14, %v504_v1  ;;  %v2269_v1 = vld [vmem:[%s2554_s18] ss:$0 sm:$0xff]  ;;  %s1803_s18 = smov 32  }
 0x22b   :  { %v507_v2 = vpop.f32.mrf.mxu1 }
 0x22c   :  { %v508_v24 = vadd.f32 %v2185_v14, %v507_v2 }
 0x233   :  { %v510_v7 = vpop.f32.mrf.mxu1 }
 0x234   :  { %v511_v23 = vadd.f32 %v2185_v14, %v510_v7 }
 0x23b   :  { %v513_v9 = vpop.f32.mrf.mxu1 }
 0x23c   :  { %v514_v22 = vadd.f32 %v2185_v14, %v513_v9 }
 0x243   :  { %v516_v10 = vpop.f32.mrf.mxu1 }
 0x244   :  { %v517_v21 = vadd.f32 %v2185_v14, %v516_v10 }
 0x24b   :  { %v519_v11 = vpop.f32.mrf.mxu1 }
 0x24c   :  { %v520_v20 = vadd.f32 %v2185_v14, %v519_v11 }
 0x253   :  { %v522_v12 = vpop.f32.mrf.mxu1 }
 0x254   :  { %v523_v19 = vadd.f32 %v2185_v14, %v522_v12 }
 0x25b   :  { %v525_v15 = vpop.f32.mrf.mxu1 }
 0x25c   :  { %v526_v18 = vadd.f32 %v2185_v14, %v525_v15 }
 0x25e   :  { %543 = vmatpush.msrb.mxu2 %v526_v18 }
 0x260   :  { %544 = vmatpush.msrb.mxu2 %v523_v19 }
 0x262   :  { %545 = vmatpush.msrb.mxu2 %v520_v20 }
 0x264   :  { %546 = vmatpush.msrb.mxu2 %v517_v21 }
 0x266   :  { %547 = vmatpush.msrb.mxu2 %v514_v22 }
 0x268   :  { %548 = vmatpush.msrb.mxu2 %v511_v23 }
 0x26a   :  { %549 = vmatpush.msrb.mxu2 %v508_v24 }
 0x26c   :  { %550 = vmatpush.msrb.mxu2 %v505_v25 }
 0x26d   :  { %1658 = vmatmul.msk.f32.vlgmr.msrb.gmra.mxu2 %vm528_vm5, %v2198_v26 }
 0x26e   :  { %576 = vmatpush.msra.mxu2 %v2203_v27 }
 0x270   :  { %577 = vmatpush.msra.mxu2 %v2210_v28 }
 0x272   :  { %578 = vmatpush.msra.mxu2 %v2216_v29 }
 0x274   :  { %579 = vmatpush.msra.mxu2 %v2230_v32 }
 0x275   :  { %1659 = vmatmul.msk.f32.gmra.mxu2 %vm528_vm5, %v2222_v30 }
 0x276   :  { %601 = vmatpush.msrb.mxu2 %v2236_v52 }
 0x278   :  { %602 = vmatpush.msrb.mxu2 %v2241_v53 }
 0x2f0   :  { %v552_v55 = vpop.f32.mrf.mxu2 }
 0x2f1   :  { %1660 = vmatmul.msk.f32.vlgmr.msra.gmra.mxu2 %vm462_vm4, %v552_v55 }
 0x2f2   :  { %718 = vmatpush.msra.mxu2 %v1948_v3 }
 0x2f4   :  { %719 = vmatpush.msra.mxu2 %v1960_v5 }
 0x2f8   :  { %v555_v56 = vpop.f32.mrf.mxu2 }
 0x2f9   :  { %1661 = vmatmul.msk.f32.gmra.mxu2 %vm462_vm4, %v555_v56 }
 0x301   :  { %1662 = vmatmul.msk.f32.vlgmr.msrb.gmra.mxu2 %vm196_vm3, %v1988_v13 }
 0x302   :  { %884 = vmatpush.msrb.mxu2 %v2134_v48 }
 0x304   :  { %885 = vmatpush.msrb.mxu2 %v2140_v49 }
 0x306   :  { %886 = vmatpush.msrb.mxu2 %v2146_v50 }
 0x308   :  { %887 = vmatpush.msrb.mxu2 %v2152_v51 }
 0x309   :  { %1663 = vmatmul.msk.f32.gmra.mxu2 %vm196_vm3, %v1998_v16 }
 0x374   :  { %v581_v57 = vpop.f32.mrf.mxu2 }
 0x375   :  { %v582_v2 = vadd.f32 %v2269_v1, %v581_v57 }
 0x37c   :  { %v584_v58 = vpop.f32.mrf.mxu2 }
 0x37d   :  { %v585_v10 = vadd.f32 %v2269_v1, %v584_v58 }
 0x384   :  { %v604_v60 = vpop.f32.mrf.mxu2 }
 0x385   :  { %v605_v62 = vadd.f32 %v2260_v59, %v604_v60 }
 0x387   :  { %652 = vrot.lane.b32.xlu0 %v605_v62, %s1802_s11  ;;  %v610_v7 = vadd.f32 %v605_v62, %v582_v2 }
 0x389   :  { %v1664_v9 = vmul.f32 -1.442695, %v610_v7 }
 0x38b   :  { %1758 = vpow2.f32 %v1664_v9 }
 0x38c   :  { %v607_v63 = vpop.f32.mrf.mxu2 }
 0x38d   :  { %v608_v0 = vadd.f32 %v2260_v59, %v607_v63 }
 0x38f   :  { %654 = vrot.lane.b32.xlu0 %v608_v0, %s1802_s11  ;;  %v611_v11 = vadd.f32 %v608_v0, %v585_v10 }
 0x391   :  { %v1665_v12 = vmul.f32 -1.442695, %v611_v11  ;;  %v1759_v15 = vpop.eup %1758 }
 0x392   :  { %v618_v18 = vadd.f32 1.0, %v1759_v15 }
 0x393   :  { %1760 = vpow2.f32 %v1665_v12 }
 0x394   :  { %1762 = vrcp.f32 %v618_v18  ;;  %v631_v58 = vand.u32 2147483648, %v618_v18  ;;  %vm625_vm7 = vweird.f32 %v618_v18  ;;  %v629_v60 = vand.u32 2147483647, %v618_v18 }
 0x396   :  { %v632_v0 = vor.u32 1.1754944e-38, %v631_v58  ;;  %vm630_vm9 = vcmp.eq.f32.partialorder %v629_v60, 8.507059e+37 }
 0x399   :  { %v1761_v19 = vpop.eup %1760 }
 0x39a   :  { %v619_v20 = vadd.f32 1.0, %v1761_v19  ;;  %v1763_v21 = vpop.eup %1762 }
 0x39b   :  { %v621_v22 = vmul.f32 %v1763_v21, %v618_v18  ;;  %vm626_vm6 = vweird.f32 %v1763_v21 }
 0x39c   :  { %1764 = vrcp.f32 %v619_v20  ;;  %vm627_vm8 = vmor %vm625_vm7, %vm626_vm6  ;;  %v646_v15 = vand.u32 2147483648, %v619_v20  ;;  %vm640_vm11 = vweird.f32 %v619_v20  ;;  %v644_v19 = vand.u32 2147483647, %v619_v20 }
 0x39d   :  { %v622_v23 = vsub.f32 1.0, %v621_v22 }
 0x39e   :  { %vm645_vm13 = vcmp.eq.f32.partialorder %v644_v19, 8.507059e+37 }
 0x39f   :  { %v623_v25 = vmul.f32 %v1763_v21, %v622_v23  ;;  %v647_v23 = vor.u32 1.1754944e-38, %v646_v15 }
 0x3a1   :  { %v624_v56 = vadd.f32 %v1763_v21, %v623_v25 }
 0x3a2   :  { %v1765_v24 = vpop.eup %1764 }
 0x3a3   :  { %v636_v55 = vmul.f32 %v1765_v24, %v619_v20  ;;  %v628_v62 = vsel %vm627_vm8, %v1763_v21, %v624_v56  ;;  %vm641_vm10 = vweird.f32 %v1765_v24 }
 0x3a4   :  { %v633_v9 = vsel %vm630_vm9, %v632_v0, %v628_v62  ;;  %vm642_vm12 = vmor %vm640_vm11, %vm641_vm10 }
 0x3a5   :  { %v637_v57 = vsub.f32 1.0, %v636_v55  ;;  %v672_v62 = vsub.f32 1.0, %v633_v9 }
 0x3a7   :  { %v638_v63 = vmul.f32 %v1765_v24, %v637_v57 }
 0x3a9   :  { %v639_v12 = vadd.f32 %v1765_v24, %v638_v63 }
 0x3ab   :  { %v643_v22 = vsel %vm642_vm12, %v1765_v24, %v639_v12 }
 0x3ac   :  { %v648_v21 = vsel %vm645_vm13, %v647_v23, %v643_v22 }
 0x3f9   :  { %v653_v7 = vpop.permute.xlu0 %652 }
 0x3fa   :  { %v658_v11 = vmul.f32 %v653_v7, %v633_v9 }
 0x3fc   :  { %662 = vrot.lane.b32.xlu1 %v658_v11, %s1803_s18 }
 0x401   :  { %v655_v18 = vpop.permute.xlu0 %654 }
 0x402   :  { %v659_v25 = vmul.f32 %v655_v18, %v648_v21 }
 0x404   :  { %664 = vrot.lane.b32.xlu1 %v659_v25, %s1803_s18 }
 0x40c   :  { %686 = vrot.lane.b32.xlu1 %v1998_v16, %s1804_s20 }
 0x46e   :  { %v663_v55 = vpop.permute.xlu1 %662 }
 0x46f   :  { %v668_v56 = vadd.f32 %v663_v55, %v582_v2 }
 0x471   :  { %1766 = vtanh.f32 %v668_v56 }
 0x476   :  { %v665_v57 = vpop.permute.xlu1 %664 }
 0x477   :  { %v1767_v58 = vpop.eup %1766  ;;  %v669_v60 = vadd.f32 %v665_v57, %v585_v10  ;;  %v673_v10 = vsub.f32 1.0, %v648_v21 }
 0x478   :  { %676 = vrot.lane.b32.xlu2 %v1767_v58, %s1805_s0 }
 0x479   :  { %1768 = vtanh.f32 %v669_v60 }
 0x47e   :  { %v687_v2 = vpop.permute.xlu1 %686 }
 0x47f   :  { %v1769_v20 = vpop.eup %1768  ;;  %v691_v12 = vmul.f32 %v687_v2, %v648_v21 }
 0x480   :  { %684 = vrot.lane.b32.xlu2 %v1988_v13, %s1804_s20  ;;  %678 = vrot.lane.b32.xlu0 %v1769_v20, %s1805_s0 }
 0x4d2   :  { %v677_v24 = vpop.permute.xlu2 %676 }
 0x4d3   :  { %v682_v0 = vmul.f32 %v677_v24, %v672_v62 }
 0x4da   :  { %v685_v63 = vpop.permute.xlu2 %684 }
 0x4db   :  { %v690_v16 = vmul.f32 %v685_v63, %v633_v9 }
 0x4dd   :  { %v2279_v7 = vadd.f32 %v690_v16, %v682_v0 }
 0x4df   :  { %696 = vrot.lane.b32.xlu2 %v2279_v7, %s1805_s0 }
 0x4f2   :  { %v679_v11 = vpop.permute.xlu0 %678 }
 0x4f3   :  { %v683_v15 = vmul.f32 %v679_v11, %v673_v10 }
 0x4f5   :  { %v2283_v19 = vadd.f32 %v691_v12, %v683_v15 }
 0x4f7   :  { %698 = vrot.lane.b32.xlu0 %v2283_v19, %s1805_s0 }
 0x539   :  { %v2287_v13 = vpop.permute.xlu2 %696 }
 0x53a   :  { %1666 = vmatmul.msk.f32.vlgmr.msra.gmra.mxu2 %vm196_vm3, %v2287_v13  ;;  %1668 = vmatmul.msk.f32.vlgmr.msra.gmra.mxu3 %vm196_vm3, %v2287_v13 }
 0x569   :  { %v2293_v9 = vpop.permute.xlu0 %698 }
 0x56a   :  { %1667 = vmatmul.msk.f32.gmra.mxu2 %vm196_vm3, %v2293_v9  ;;  %1669 = vmatmul.msk.f32.gmra.mxu3 %vm196_vm3, %v2293_v9 }
 0x5bd   :  { %v721_v22 = vpop.f32.mrf.mxu2  ;;  %v744_v23 = vpop.f32.mrf.mxu3 }
 0x5ed   :  { %v724_v18 = vpop.f32.mrf.mxu2  ;;  %v747_v21 = vpop.f32.mrf.mxu3 }
 0x5ee   :  { %764 = vmatpush.msrb.mxu0 %v747_v21  ;;  %805 = vmatpush.msra.mxu1 %v724_v18 }
 0x5f0   :  { %765 = vmatpush.msrb.mxu0 %v744_v23  ;;  %806 = vmatpush.msra.mxu1 %v721_v22 }
 0x5f1   :  { %1670 = vmatmul.msk.f32.vlgmr.msrb.gmra.mxu0 %vm196_vm3, %v2020_v31  ;;  %1678 = vmatmul.msk.f32.vlgmr.msra.gmra.mxu1 %vm196_vm3, %v2028_v33 }
 0x5f2   :  { %1113 = vmatpush.msra.mxu0 %v1953_v4 }
 0x5f4   :  { %1114 = vmatpush.msra.mxu0 %v1965_v6 }
 0x5f9   :  { %1671 = vmatmul.msk.f32.gmra.mxu0 %vm196_vm3, %v2034_v34  ;;  %1679 = vmatmul.msk.f32.gmra.mxu1 %vm196_vm3, %v2043_v35 }
 0x601   :  { %1672 = vmatmul.msk.f32.gmra.mxu0 %vm196_vm3, %v2048_v36  ;;  %1680 = vmatmul.msk.f32.gmra.mxu1 %vm196_vm3, %v2057_v37 }
 0x609   :  { %1673 = vmatmul.msk.f32.gmra.mxu0 %vm196_vm3, %v2062_v38  ;;  %1681 = vmatmul.msk.f32.gmra.mxu1 %vm196_vm3, %v2071_v39 }
 0x611   :  { %1674 = vmatmul.msk.f32.gmra.mxu0 %vm196_vm3, %v2076_v40  ;;  %1682 = vmatmul.msk.f32.gmra.mxu1 %vm196_vm3, %v2085_v41 }
 0x619   :  { %1675 = vmatmul.msk.f32.gmra.mxu0 %vm196_vm3, %v2090_v42  ;;  %1683 = vmatmul.msk.f32.gmra.mxu1 %vm196_vm3, %v2099_v43 }
 0x621   :  { %1676 = vmatmul.msk.f32.gmra.mxu0 %vm196_vm3, %v2104_v44  ;;  %1684 = vmatmul.msk.f32.gmra.mxu1 %vm196_vm3, %v2113_v45 }
 0x629   :  { %1677 = vmatmul.msk.f32.gmra.mxu0 %vm196_vm3, %v2118_v46  ;;  %1685 = vmatmul.msk.f32.gmra.mxu1 %vm196_vm3, %v2127_v47 }
 0x66e   :  { %v767_v4 = vpop.f32.mrf.mxu0  ;;  %v808_v6 = vpop.f32.mrf.mxu1 }
 0x66f   :  { %v809_v25 = vadd.f32 %v808_v6, %v767_v4 }
 0x671   :  { %v832_v55 = vadd.f32 %v809_v25, %v2158_v54 }
 0x673   :  { %v840_v56 = vmax.f32 %v832_v55, 0.0 }
 0x675   :  { %1686 = vmatmul.msk.f32.vlgmr.msrb.gmra.mxu2 %vm462_vm4, %v840_v56 }
 0x676   :  { %v770_v57 = vpop.f32.mrf.mxu0  ;;  %v811_v58 = vpop.f32.mrf.mxu1 }
 0x677   :  { %v812_v60 = vadd.f32 %v811_v58, %v770_v57 }
 0x679   :  { %v833_v20 = vadd.f32 %v812_v60, %v2162_v61 }
 0x67b   :  { %v841_v24 = vmax.f32 %v833_v20, 0.0 }
 0x67d   :  { %1687 = vmatmul.msk.f32.gmra.mxu2 %vm462_vm4, %v841_v24 }
 0x67e   :  { %v773_v62 = vpop.f32.mrf.mxu0  ;;  %v814_v63 = vpop.f32.mrf.mxu1 }
 0x67f   :  { %v815_v0 = vadd.f32 %v814_v63, %v773_v62 }
 0x681   :  { %v834_v16 = vadd.f32 %v815_v0, %v2166_v8 }
 0x683   :  { %v842_v2 = vmax.f32 %v834_v16, 0.0 }
 0x685   :  { %1688 = vmatmul.msk.f32.gmra.mxu2 %vm462_vm4, %v842_v2 }
 0x686   :  { %v776_v10 = vpop.f32.mrf.mxu0  ;;  %v817_v11 = vpop.f32.mrf.mxu1 }
 0x687   :  { %v818_v12 = vadd.f32 %v817_v11, %v776_v10 }
 0x689   :  { %v835_v15 = vadd.f32 %v818_v12, %v2170_v17 }
 0x68b   :  { %v843_v22 = vmax.f32 %v835_v15, 0.0 }
 0x68d   :  { %1689 = vmatmul.msk.f32.gmra.mxu2 %vm462_vm4, %v843_v22 }
 0x68e   :  { %v779_v23 = vpop.f32.mrf.mxu0  ;;  %v820_v18 = vpop.f32.mrf.mxu1 }
 0x68f   :  { %v821_v21 = vadd.f32 %v820_v18, %v779_v23 }
 0x691   :  { %v836_v4 = vadd.f32 %v821_v21, %v2158_v54 }
 0x693   :  { %v844_v6 = vmax.f32 %v836_v4, 0.0 }
 0x695   :  { %1690 = vmatmul.msk.f32.gmra.mxu2 %vm462_vm4, %v844_v6 }
 0x696   :  { %v782_v25 = vpop.f32.mrf.mxu0  ;;  %v823_v55 = vpop.f32.mrf.mxu1 }
 0x697   :  { %v824_v56 = vadd.f32 %v823_v55, %v782_v25 }
 0x699   :  { %v837_v57 = vadd.f32 %v824_v56, %v2162_v61 }
 0x69b   :  { %v845_v58 = vmax.f32 %v837_v57, 0.0 }
 0x69d   :  { %1691 = vmatmul.msk.f32.gmra.mxu2 %vm462_vm4, %v845_v58 }
 0x69e   :  { %v785_v60 = vpop.f32.mrf.mxu0  ;;  %v826_v20 = vpop.f32.mrf.mxu1 }
 0x69f   :  { %v827_v24 = vadd.f32 %v826_v20, %v785_v60 }
 0x6a1   :  { %v838_v62 = vadd.f32 %v827_v24, %v2166_v8 }
 0x6a3   :  { %v846_v63 = vmax.f32 %v838_v62, 0.0 }
 0x6a5   :  { %1692 = vmatmul.msk.f32.gmra.mxu2 %vm462_vm4, %v846_v63 }
 0x6a6   :  { %v788_v0 = vpop.f32.mrf.mxu0  ;;  %v829_v16 = vpop.f32.mrf.mxu1 }
 0x6a7   :  { %v830_v2 = vadd.f32 %v829_v16, %v788_v0 }
 0x6a9   :  { %v839_v10 = vadd.f32 %v830_v2, %v2170_v17 }
 0x6ab   :  { %v847_v11 = vmax.f32 %v839_v10, 0.0 }
 0x6ad   :  { %1693 = vmatmul.msk.f32.gmra.mxu2 %vm462_vm4, %v847_v11 }
 0x6f8   :  { %v889_v12 = vpop.f32.mrf.mxu2 }
 0x6f9   :  { %v890_v24 = vadd.f32 %v2185_v14, %v889_v12 }
 0x700   :  { %v892_v15 = vpop.f32.mrf.mxu2 }
 0x701   :  { %v893_v20 = vadd.f32 %v2185_v14, %v892_v15 }
 0x708   :  { %v895_v22 = vpop.f32.mrf.mxu2 }
 0x709   :  { %v896_v60 = vadd.f32 %v2185_v14, %v895_v22 }
 0x710   :  { %v898_v23 = vpop.f32.mrf.mxu2 }
 0x711   :  { %v899_v58 = vadd.f32 %v2185_v14, %v898_v23 }
 0x718   :  { %v901_v18 = vpop.f32.mrf.mxu2 }
 0x719   :  { %v902_v57 = vadd.f32 %v2185_v14, %v901_v18 }
 0x720   :  { %v904_v21 = vpop.f32.mrf.mxu2 }
 0x721   :  { %v905_v56 = vadd.f32 %v2185_v14, %v904_v21 }
 0x728   :  { %v907_v4 = vpop.f32.mrf.mxu2 }
 0x729   :  { %v908_v55 = vadd.f32 %v2185_v14, %v907_v4 }
 0x730   :  { %v910_v6 = vpop.f32.mrf.mxu2 }
 0x731   :  { %v911_v25 = vadd.f32 %v2185_v14, %v910_v6 }
 0x733   :  { %921 = vmatpush.msrb.mxu3 %v911_v25 }
 0x735   :  { %922 = vmatpush.msrb.mxu3 %v908_v55 }
 0x737   :  { %923 = vmatpush.msrb.mxu3 %v905_v56 }
 0x739   :  { %924 = vmatpush.msrb.mxu3 %v902_v57 }
 0x73b   :  { %925 = vmatpush.msrb.mxu3 %v899_v58 }
 0x73d   :  { %926 = vmatpush.msrb.mxu3 %v896_v60 }
 0x73f   :  { %927 = vmatpush.msrb.mxu3 %v893_v20 }
 0x741   :  { %928 = vmatpush.msrb.mxu3 %v890_v24 }
 0x742   :  { %1694 = vmatmul.msk.f32.vlgmr.msrb.gmra.mxu3 %vm528_vm5, %v2198_v26 }
 0x743   :  { %954 = vmatpush.msra.mxu3 %v2203_v27 }
 0x745   :  { %955 = vmatpush.msra.mxu3 %v2210_v28 }
 0x747   :  { %956 = vmatpush.msra.mxu3 %v2216_v29 }
 0x749   :  { %957 = vmatpush.msra.mxu3 %v2230_v32 }
 0x74a   :  { %1695 = vmatmul.msk.f32.gmra.mxu3 %vm528_vm5, %v2222_v30 }
 0x74b   :  { %979 = vmatpush.msrb.mxu3 %v2236_v52 }
 0x74d   :  { %980 = vmatpush.msrb.mxu3 %v2241_v53 }
 0x7c5   :  { %v930_v62 = vpop.f32.mrf.mxu3 }
 0x7c6   :  { %1696 = vmatmul.msk.f32.vlgmr.msra.gmra.mxu3 %vm462_vm4, %v930_v62 }
 0x7c7   :  { %1090 = vmatpush.msra.mxu3 %v1948_v3 }
 0x7c9   :  { %1091 = vmatpush.msra.mxu3 %v1960_v5 }
 0x7cd   :  { %v933_v63 = vpop.f32.mrf.mxu3 }
 0x7ce   :  { %1697 = vmatmul.msk.f32.gmra.mxu3 %vm462_vm4, %v933_v63 }
 0x7d6   :  { %1698 = vmatmul.msk.f32.vlgmr.msrb.gmra.mxu3 %vm196_vm3, %v2287_v13 }
 0x7d7   :  { %1256 = vmatpush.msrb.mxu3 %v2134_v48 }
 0x7d9   :  { %1257 = vmatpush.msrb.mxu3 %v2140_v49 }
 0x7db   :  { %1258 = vmatpush.msrb.mxu3 %v2146_v50 }
 0x7dd   :  { %1259 = vmatpush.msrb.mxu3 %v2152_v51 }
 0x7de   :  { %1699 = vmatmul.msk.f32.gmra.mxu3 %vm196_vm3, %v2293_v9 }
 0x849   :  { %v959_v3 = vpop.f32.mrf.mxu3 }
 0x84a   :  { %v960_v9 = vadd.f32 %v2269_v1, %v959_v3 }
 0x851   :  { %v962_v0 = vpop.f32.mrf.mxu3 }
 0x852   :  { %v963_v48 = vadd.f32 %v2269_v1, %v962_v0 }
 0x859   :  { %v982_v5 = vpop.f32.mrf.mxu3 }
 0x85a   :  { %v983_v16 = vadd.f32 %v2260_v59, %v982_v5 }
 0x85c   :  { %1030 = vrot.lane.b32.xlu1 %v983_v16, %s1802_s11  ;;  %v988_v10 = vadd.f32 %v983_v16, %v960_v9 }
 0x85e   :  { %v1700_v12 = vmul.f32 -1.442695, %v988_v10 }
 0x861   :  { %v985_v2 = vpop.f32.mrf.mxu3 }
 0x862   :  { %v986_v13 = vadd.f32 %v2260_v59, %v985_v2 }
 0x864   :  { %1032 = vrot.lane.b32.xlu2 %v986_v13, %s1802_s11  ;;  %v989_v49 = vadd.f32 %v986_v13, %v963_v48 }
 0x866   :  { %v1701_v50 = vmul.f32 -1.442695, %v989_v49 }
 0x868   :  { %1770 = vpow2.f32 %v1701_v50 }
 0x86e   :  { %v1771_v51 = vpop.eup %1770 }
 0x86f   :  { %v997_v11 = vadd.f32 1.0, %v1771_v51 }
 0x871   :  { %1772 = vrcp.f32 %v997_v11  ;;  %v1024_v55 = vand.u32 2147483648, %v997_v11  ;;  %vm1018_vm15 = vweird.f32 %v997_v11  ;;  %v1022_v56 = vand.u32 2147483647, %v997_v11 }
 0x872   :  { %1774 = vpow2.f32 %v1700_v12 }
 0x873   :  { %v1025_v60 = vor.u32 1.1754944e-38, %v1024_v55  ;;  %vm1023_vm6 = vcmp.eq.f32.partialorder %v1022_v56, 8.507059e+37 }
 0x877   :  { %v1773_v15 = vpop.eup %1772 }
 0x878   :  { %v1775_v22 = vpop.eup %1774  ;;  %v1014_v23 = vmul.f32 %v1773_v15, %v997_v11  ;;  %vm1019_vm14 = vweird.f32 %v1773_v15 }
 0x879   :  { %v996_v18 = vadd.f32 1.0, %v1775_v22  ;;  %vm1020_vm0 = vmor %vm1018_vm15, %vm1019_vm14 }
 0x87a   :  { %v1015_v21 = vsub.f32 1.0, %v1014_v23 }
 0x87b   :  { %1776 = vrcp.f32 %v996_v18  ;;  %v1009_v5 = vand.u32 2147483648, %v996_v18  ;;  %vm1003_vm8 = vweird.f32 %v996_v18  ;;  %v1007_v16 = vand.u32 2147483647, %v996_v18 }
 0x87c   :  { %v1016_v4 = vmul.f32 %v1773_v15, %v1015_v21 }
 0x87d   :  { %v1010_v13 = vor.u32 1.1754944e-38, %v1009_v5  ;;  %vm1008_vm10 = vcmp.eq.f32.partialorder %v1007_v16, 8.507059e+37 }
 0x87e   :  { %v1017_v6 = vadd.f32 %v1773_v15, %v1016_v4 }
 0x880   :  { %v1021_v57 = vsel %vm1020_vm0, %v1773_v15, %v1017_v6 }
 0x881   :  { %v1777_v25 = vpop.eup %1776  ;;  %v1026_v24 = vsel %vm1023_vm6, %v1025_v60, %v1021_v57 }
 0x882   :  { %v999_v58 = vmul.f32 %v1777_v25, %v996_v18  ;;  %vm1004_vm7 = vweird.f32 %v1777_v25  ;;  %v1063_v56 = vmul.f32 %v1026_v24, %v2283_v19 }
 0x883   :  { %vm1005_vm9 = vmor %vm1003_vm8, %vm1004_vm7 }
 0x884   :  { %v1000_v63 = vsub.f32 1.0, %v999_v58 }
 0x886   :  { %v1001_v3 = vmul.f32 %v1777_v25, %v1000_v63 }
 0x888   :  { %v1002_v0 = vadd.f32 %v1777_v25, %v1001_v3 }
 0x88a   :  { %v1006_v2 = vsel %vm1005_vm9, %v1777_v25, %v1002_v0 }
 0x88b   :  { %v1011_v50 = vsel %vm1008_vm10, %v1010_v13, %v1006_v2 }
 0x88c   :  { %v1050_v18 = vsub.f32 1.0, %v1011_v50  ;;  %v1062_v4 = vmul.f32 %v1011_v50, %v2279_v7 }
 0x8be   :  { %v1033_v20 = vpop.permute.xlu2 %1032 }
 0x8bf   :  { %v1037_v62 = vmul.f32 %v1033_v20, %v1026_v24 }
 0x8c1   :  { %1042 = vrot.lane.b32.xlu1 %v1037_v62, %s1803_s18 }
 0x8ce   :  { %v1031_v49 = vpop.permute.xlu1 %1030 }
 0x8cf   :  { %v1036_v51 = vmul.f32 %v1031_v49, %v1011_v50 }
 0x8d1   :  { %1040 = vrot.lane.b32.xlu0 %v1036_v51, %s1803_s18 }
 0x933   :  { %v1043_v10 = vpop.permute.xlu1 %1042 }
 0x934   :  { %v1047_v11 = vadd.f32 %v1043_v10, %v963_v48  ;;  %v1051_v48 = vsub.f32 1.0, %v1026_v24 }
 0x936   :  { %1778 = vtanh.f32 %v1047_v11 }
 0x93c   :  { %v1779_v12 = vpop.eup %1778 }
 0x93d   :  { %1056 = vrot.lane.b32.xlu0 %v1779_v12, %s1805_s0 }
 0x943   :  { %v1041_v15 = vpop.permute.xlu0 %1040 }
 0x944   :  { %v1046_v22 = vadd.f32 %v1041_v15, %v960_v9 }
 0x946   :  { %1780 = vtanh.f32 %v1046_v22 }
 0x94c   :  { %v1781_v23 = vpop.eup %1780 }
 0x94d   :  { %1054 = vrot.lane.b32.xlu2 %v1781_v23, %s1805_s0 }
 0x9a7   :  { %v1055_v21 = vpop.permute.xlu2 %1054 }
 0x9a8   :  { %v1060_v6 = vmul.f32 %v1055_v21, %v1050_v18 }
 0x9aa   :  { %v2390_v25 = vadd.f32 %v1062_v4, %v1060_v6 }
 0x9ac   :  { %1068 = vrot.lane.b32.xlu1 %v2390_v25, %s1805_s0 }
 0x9af   :  { %v1057_v55 = vpop.permute.xlu0 %1056 }
 0x9b0   :  { %v1061_v57 = vmul.f32 %v1057_v55, %v1051_v48 }
 0x9b2   :  { %v2395_v9 = vadd.f32 %v1063_v56, %v1061_v57 }
 0x9b4   :  { %1070 = vrot.lane.b32.xlu2 %v2395_v9, %s1805_s0 }
 0xa0e   :  { %v2405_v7 = vpop.permute.xlu2 %1070 }
 0xa1e   :  { %v2399_v58 = vpop.permute.xlu1 %1068 }
 0xa1f   :  { %1702 = vmatmul.msk.f32.vlgmr.msra.gmra.mxu3 %vm196_vm3, %v2399_v58  ;;  %1704 = vmatmul.msk.f32.vlgmr.msra.gmra.mxu0 %vm196_vm3, %v2399_v58 }
 0xa27   :  { %1703 = vmatmul.msk.f32.gmra.mxu3 %vm196_vm3, %v2405_v7  ;;  %1705 = vmatmul.msk.f32.gmra.mxu0 %vm196_vm3, %v2405_v7 }
 0xa9c   :  { %v1116_v19 = vpop.f32.mrf.mxu0 }
 0xaa2   :  { %v1093_v60 = vpop.f32.mrf.mxu3 }
 0xaa4   :  { %v1119_v20 = vpop.f32.mrf.mxu0 }
 0xaa5   :  { %1136 = vmatpush.msrb.mxu1 %v1119_v20 }
 0xaa7   :  { %1137 = vmatpush.msrb.mxu1 %v1116_v19 }
 0xaa8   :  { %1706 = vmatmul.msk.f32.vlgmr.msrb.gmra.mxu1 %vm196_vm3, %v2020_v31 }
 0xaaa   :  { %v1096_v24 = vpop.f32.mrf.mxu3 }
 0xaab   :  { %1177 = vmatpush.msra.mxu2 %v1096_v24 }
 0xaad   :  { %1178 = vmatpush.msra.mxu2 %v1093_v60 }
 0xaae   :  { %1714 = vmatmul.msk.f32.vlgmr.msra.gmra.mxu2 %vm196_vm3, %v2028_v33 }
 0xab0   :  { %1707 = vmatmul.msk.f32.gmra.mxu1 %vm196_vm3, %v2034_v34 }
 0xab6   :  { %1715 = vmatmul.msk.f32.gmra.mxu2 %vm196_vm3, %v2043_v35 }
 0xab8   :  { %1708 = vmatmul.msk.f32.gmra.mxu1 %vm196_vm3, %v2048_v36 }
 0xabe   :  { %1716 = vmatmul.msk.f32.gmra.mxu2 %vm196_vm3, %v2057_v37 }
 0xac0   :  { %1709 = vmatmul.msk.f32.gmra.mxu1 %vm196_vm3, %v2062_v38 }
 0xac6   :  { %1717 = vmatmul.msk.f32.gmra.mxu2 %vm196_vm3, %v2071_v39 }
 0xac8   :  { %1710 = vmatmul.msk.f32.gmra.mxu1 %vm196_vm3, %v2076_v40 }
 0xace   :  { %1718 = vmatmul.msk.f32.gmra.mxu2 %vm196_vm3, %v2085_v41 }
 0xad0   :  { %1711 = vmatmul.msk.f32.gmra.mxu1 %vm196_vm3, %v2090_v42 }
 0xad6   :  { %1719 = vmatmul.msk.f32.gmra.mxu2 %vm196_vm3, %v2099_v43 }
 0xad8   :  { %1712 = vmatmul.msk.f32.gmra.mxu1 %vm196_vm3, %v2104_v44 }
 0xade   :  { %1720 = vmatmul.msk.f32.gmra.mxu2 %vm196_vm3, %v2113_v45 }
 0xae0   :  { %1713 = vmatmul.msk.f32.gmra.mxu1 %vm196_vm3, %v2118_v46 }
 0xae6   :  { %1721 = vmatmul.msk.f32.gmra.mxu2 %vm196_vm3, %v2127_v47 }
 0xb25   :  { %v1139_v31 = vpop.f32.mrf.mxu1 }
 0xb2d   :  { %v1142_v33 = vpop.f32.mrf.mxu1 }
 0xb31   :  { %v1180_v34 = vpop.f32.mrf.mxu2 }
 0xb32   :  { %v1181_v35 = vadd.f32 %v1180_v34, %v1139_v31 }
 0xb34   :  { %v1204_v36 = vadd.f32 %v1181_v35, %v2158_v54 }
 0xb35   :  { %v1145_v37 = vpop.f32.mrf.mxu1 }
 0xb36   :  { %v1212_v38 = vmax.f32 %v1204_v36, 0.0 }
 0xb38   :  { %1722 = vmatmul.msk.f32.vlgmr.msrb.gmra.mxu3 %vm462_vm4, %v1212_v38 }
 0xb39   :  { %v1183_v39 = vpop.f32.mrf.mxu2 }
 0xb3a   :  { %v1184_v40 = vadd.f32 %v1183_v39, %v1142_v33 }
 0xb3c   :  { %v1205_v41 = vadd.f32 %v1184_v40, %v2162_v61 }
 0xb3d   :  { %v1148_v43 = vpop.f32.mrf.mxu1 }
 0xb3e   :  { %v1213_v42 = vmax.f32 %v1205_v41, 0.0 }
 0xb40   :  { %1723 = vmatmul.msk.f32.gmra.mxu3 %vm462_vm4, %v1213_v42 }
 0xb41   :  { %v1186_v44 = vpop.f32.mrf.mxu2 }
 0xb42   :  { %v1187_v45 = vadd.f32 %v1186_v44, %v1145_v37 }
 0xb44   :  { %v1206_v46 = vadd.f32 %v1187_v45, %v2166_v8 }
 0xb45   :  { %v1151_v63 = vpop.f32.mrf.mxu1 }
 0xb46   :  { %v1214_v47 = vmax.f32 %v1206_v46, 0.0 }
 0xb48   :  { %1724 = vmatmul.msk.f32.gmra.mxu3 %vm462_vm4, %v1214_v47 }
 0xb49   :  { %v1189_v62 = vpop.f32.mrf.mxu2 }
 0xb4a   :  { %v1190_v3 = vadd.f32 %v1189_v62, %v1148_v43 }
 0xb4c   :  { %v1207_v0 = vadd.f32 %v1190_v3, %v2170_v17 }
 0xb4d   :  { %v1154_v13 = vpop.f32.mrf.mxu1 }
 0xb4e   :  { %v1215_v5 = vmax.f32 %v1207_v0, 0.0 }
 0xb50   :  { %1725 = vmatmul.msk.f32.gmra.mxu3 %vm462_vm4, %v1215_v5 }
 0xb51   :  { %v1192_v16 = vpop.f32.mrf.mxu2 }
 0xb52   :  { %v1193_v2 = vadd.f32 %v1192_v16, %v1151_v63 }
 0xb54   :  { %v1208_v49 = vadd.f32 %v1193_v2, %v2158_v54 }
 0xb55   :  { %v1157_v12 = vpop.f32.mrf.mxu1 }
 0xb56   :  { %v1216_v50 = vmax.f32 %v1208_v49, 0.0 }
 0xb58   :  { %1726 = vmatmul.msk.f32.gmra.mxu3 %vm462_vm4, %v1216_v50 }
 0xb59   :  { %v1195_v51 = vpop.f32.mrf.mxu2 }
 0xb5a   :  { %v1196_v10 = vadd.f32 %v1195_v51, %v1154_v13 }
 0xb5c   :  { %v1209_v11 = vadd.f32 %v1196_v10, %v2162_v61 }
 0xb5d   :  { %v1160_v4 = vpop.f32.mrf.mxu1 }
 0xb5e   :  { %v1217_v15 = vmax.f32 %v1209_v11, 0.0 }
 0xb60   :  { %1727 = vmatmul.msk.f32.gmra.mxu3 %vm462_vm4, %v1217_v15 }
 0xb61   :  { %v1198_v22 = vpop.f32.mrf.mxu2 }
 0xb62   :  { %v1199_v23 = vadd.f32 %v1198_v22, %v1157_v12 }
 0xb64   :  { %v1210_v18 = vadd.f32 %v1199_v23, %v2166_v8 }
 0xb66   :  { %v1218_v21 = vmax.f32 %v1210_v18, 0.0 }
 0xb68   :  { %1728 = vmatmul.msk.f32.gmra.mxu3 %vm462_vm4, %v1218_v21 }
 0xb69   :  { %v1201_v54 = vpop.f32.mrf.mxu2 }
 0xb6a   :  { %v1202_v6 = vadd.f32 %v1201_v54, %v1160_v4 }
 0xb6c   :  { %v1211_v48 = vadd.f32 %v1202_v6, %v2170_v17 }
 0xb6e   :  { %v1219_v55 = vmax.f32 %v1211_v48, 0.0 }
 0xb70   :  { %1729 = vmatmul.msk.f32.gmra.mxu3 %vm462_vm4, %v1219_v55 }
 0xbbb   :  { %v1261_v61 = vpop.f32.mrf.mxu3 }
 0xbbc   :  { %v1262_v38 = vadd.f32 %v2185_v14, %v1261_v61 }
 0xbc3   :  { %v1264_v56 = vpop.f32.mrf.mxu3 }
 0xbc4   :  { %v1265_v37 = vadd.f32 %v2185_v14, %v1264_v56 }
 0xbcb   :  { %v1267_v57 = vpop.f32.mrf.mxu3 }
 0xbcc   :  { %v1268_v36 = vadd.f32 %v2185_v14, %v1267_v57  ;;  %v1439_v57 = vld [vmem:[%s2557_s21 + $0x8] sm:$0xff] }
 0xbd3   :  { %v1270_v19 = vpop.f32.mrf.mxu3 }
 0xbd4   :  { %v1271_v35 = vadd.f32 %v2185_v14, %v1270_v19  ;;  %v1438_v19 = vld [vmem:[%s2557_s21] sm:$0xff] }
 0xbdb   :  { %v1273_v60 = vpop.f32.mrf.mxu3 }
 0xbdc   :  { %v1274_v17 = vadd.f32 %v2185_v14, %v1273_v60 }
 0xbe3   :  { %v1276_v20 = vpop.f32.mrf.mxu3 }
 0xbe4   :  { %v1277_v34 = vadd.f32 %v2185_v14, %v1276_v20 }
 0xbeb   :  { %v1279_v24 = vpop.f32.mrf.mxu3 }
 0xbec   :  { %v1280_v33 = vadd.f32 %v2185_v14, %v1279_v24 }
 0xbf3   :  { %v1282_v31 = vpop.f32.mrf.mxu3 }
 0xbf4   :  { %v1283_v8 = vadd.f32 %v2185_v14, %v1282_v31 }
 0xbf6   :  { %1293 = vmatpush.msrb.mxu0 %v1283_v8 }
 0xbf8   :  { %1294 = vmatpush.msrb.mxu0 %v1280_v33 }
 0xbfa   :  { %1295 = vmatpush.msrb.mxu0 %v1277_v34 }
 0xbfc   :  { %1296 = vmatpush.msrb.mxu0 %v1274_v17 }
 0xbfe   :  { %1297 = vmatpush.msrb.mxu0 %v1271_v35 }
 0xc00   :  { %1298 = vmatpush.msrb.mxu0 %v1268_v36 }
 0xc02   :  { %1299 = vmatpush.msrb.mxu0 %v1265_v37 }
 0xc04   :  { %1300 = vmatpush.msrb.mxu0 %v1262_v38 }
 0xc05   :  { %1730 = vmatmul.msk.f32.vlgmr.msrb.gmra.mxu0 %vm528_vm5, %v2198_v26 }
 0xc06   :  { %1326 = vmatpush.msra.mxu0 %v2203_v27 }
 0xc08   :  { %1327 = vmatpush.msra.mxu0 %v2210_v28 }
 0xc0a   :  { %1328 = vmatpush.msra.mxu0 %v2216_v29 }
 0xc0c   :  { %1329 = vmatpush.msra.mxu0 %v2230_v32 }
 0xc0d   :  { %1731 = vmatmul.msk.f32.gmra.mxu0 %vm528_vm5, %v2222_v30 }
 0xc0e   :  { %1351 = vmatpush.msrb.mxu0 %v2236_v52 }
 0xc10   :  { %1352 = vmatpush.msrb.mxu0 %v2241_v53 }
 0xc82   :  { %v1302_v14 = vpop.f32.mrf.mxu0 }
 0xc83   :  { %1732 = vmatmul.msk.f32.vlgmr.msra.gmra.mxu0 %vm462_vm4, %v1302_v14 }
 0xc84   :  { %1468 = vmatpush.msra.mxu0 %v1439_v57 }
 0xc86   :  { %1469 = vmatpush.msra.mxu0 %v1438_v19 }
 0xc8a   :  { %v1305_v39 = vpop.f32.mrf.mxu0 }
 0xc8b   :  { %1733 = vmatmul.msk.f32.gmra.mxu0 %vm462_vm4, %v1305_v39 }
 0xc93   :  { %1734 = vmatmul.msk.f32.vlgmr.msrb.gmra.mxu0 %vm196_vm3, %v2399_v58 }
 0xc9b   :  { %1735 = vmatmul.msk.f32.gmra.mxu0 %vm196_vm3, %v2405_v7 }
 0xd00   :  { %v1331_v26 = vpop.f32.mrf.mxu0 }
 0xd01   :  { %v1332_v52 = vadd.f32 %v2269_v1, %v1331_v26 }
 0xd08   :  { %v1334_v27 = vpop.f32.mrf.mxu0 }
 0xd09   :  { %v1335_v58 = vadd.f32 %v2269_v1, %v1334_v27 }
 0xd10   :  { %v1354_v28 = vpop.f32.mrf.mxu0 }
 0xd11   :  { %v1355_v29 = vadd.f32 %v2260_v59, %v1354_v28 }
 0xd13   :  { %1402 = vrot.lane.b32.xlu0 %v1355_v29, %s1802_s11  ;;  %v1360_v53 = vadd.f32 %v1355_v29, %v1332_v52 }
 0xd15   :  { %v1736_v40 = vmul.f32 -1.442695, %v1360_v53 }
 0xd17   :  { %1782 = vpow2.f32 %v1736_v40 }
 0xd18   :  { %v1357_v30 = vpop.f32.mrf.mxu0 }
 0xd19   :  { %v1358_v32 = vadd.f32 %v2260_v59, %v1357_v30 }
 0xd1b   :  { %1404 = vrot.lane.b32.xlu1 %v1358_v32, %s1802_s11  ;;  %v1361_v7 = vadd.f32 %v1358_v32, %v1335_v58 }
 0xd1d   :  { %v1737_v41 = vmul.f32 -1.442695, %v1361_v7  ;;  %v1783_v42 = vpop.eup %1782  ;;  %v1552_v7 = vld [vmem:[%s2559_s23 + $0x18] sm:$0xff] }
 0xd1e   :  { %v1368_v43 = vadd.f32 1.0, %v1783_v42  ;;  %1572 = vmatpush.msrb.mxu2 %v1552_v7 }
 0xd1f   :  { %1784 = vpow2.f32 %v1737_v41  ;;  %v1551_v41 = vld [vmem:[%s2559_s23 + $0x10] sm:$0xff] }
 0xd20   :  { %1786 = vrcp.f32 %v1368_v43  ;;  %v1381_v1 = vand.u32 2147483648, %v1368_v43  ;;  %vm1375_vm11 = vweird.f32 %v1368_v43  ;;  %v1379_v16 = vand.u32 2147483647, %v1368_v43  ;;  %1573 = vmatpush.msrb.mxu2 %v1551_v41 }
 0xd22   :  { %v1382_v49 = vor.u32 1.1754944e-38, %v1381_v1  ;;  %vm1380_vm13 = vcmp.eq.f32.partialorder %v1379_v16, 8.507059e+37 }
 0xd25   :  { %v1785_v44 = vpop.eup %1784 }
 0xd26   :  { %v1369_v45 = vadd.f32 1.0, %v1785_v44  ;;  %v1787_v46 = vpop.eup %1786 }
 0xd27   :  { %v1371_v59 = vmul.f32 %v1787_v46, %v1368_v43  ;;  %vm1376_vm5 = vweird.f32 %v1787_v46  ;;  %v1550_v43 = vld [vmem:[%s2559_s23 + $0x8] sm:$0xff] }
 0xd28   :  { %1788 = vrcp.f32 %v1369_v45  ;;  %vm1377_vm12 = vmor %vm1375_vm11, %vm1376_vm5  ;;  %v1396_v12 = vand.u32 2147483648, %v1369_v45  ;;  %vm1390_vm15 = vweird.f32 %v1369_v45  ;;  %v1394_v15 = vand.u32 2147483647, %v1369_v45  ;;  %1574 = vmatpush.msrb.mxu2 %v1550_v43 }
 0xd29   :  { %v1372_v47 = vsub.f32 1.0, %v1371_v59 }
 0xd2a   :  { %v1397_v23 = vor.u32 1.1754944e-38, %v1396_v12  ;;  %vm1395_vm6 = vcmp.eq.f32.partialorder %v1394_v15, 8.507059e+37  ;;  %v1525_v15 = vld [vmem:[%s2560_s5] sm:$0xf] }
 0xd2b   :  { %v1373_v63 = vmul.f32 %v1787_v46, %v1372_v47 }
 0xd2d   :  { %v1374_v0 = vadd.f32 %v1787_v46, %v1373_v63 }
 0xd2e   :  { %v1789_v62 = vpop.eup %1788 }
 0xd2f   :  { %v1386_v3 = vmul.f32 %v1789_v62, %v1369_v45  ;;  %v1378_v2 = vsel %vm1377_vm12, %v1787_v46, %v1374_v0  ;;  %vm1391_vm14 = vweird.f32 %v1789_v62 }
 0xd30   :  { %v1383_v51 = vsel %vm1380_vm13, %v1382_v49, %v1378_v2  ;;  %vm1392_vm0 = vmor %vm1390_vm15, %vm1391_vm14 }
 0xd31   :  { %v1387_v5 = vsub.f32 1.0, %v1386_v3  ;;  %v1422_v60 = vsub.f32 1.0, %v1383_v51  ;;  %v1434_v24 = vmul.f32 %v1383_v51, %v2390_v25  ;;  %v1756_v25 = vld [vmem:[%s2558_s22] ss:$0 sm:$0xff] }
 0xd33   :  { %v1388_v13 = vmul.f32 %v1789_v62, %v1387_v5 }
 0xd35   :  { %v1389_v11 = vadd.f32 %v1789_v62, %v1388_v13 }
 0xd37   :  { %v1393_v22 = vsel %vm1392_vm0, %v1789_v62, %v1389_v11 }
 0xd38   :  { %v1398_v21 = vsel %vm1395_vm6, %v1397_v23, %v1393_v22  ;;  %v1549_v22 = vld [vmem:[%s2559_s23] sm:$0xff] }
 0xd39   :  { %v1423_v33 = vsub.f32 1.0, %v1398_v21  ;;  %v1435_v17 = vmul.f32 %v1398_v21, %v2395_v9  ;;  %1575 = vmatpush.msrb.mxu2 %v1549_v22 }
 0xd85   :  { %v1403_v50 = vpop.permute.xlu0 %1402 }
 0xd86   :  { %v1408_v10 = vmul.f32 %v1403_v50, %v1383_v51 }
 0xd88   :  { %1412 = vrot.lane.b32.xlu2 %v1408_v10, %s1803_s18 }
 0xd8d   :  { %v1405_v18 = vpop.permute.xlu1 %1404 }
 0xd8e   :  { %v1409_v4 = vmul.f32 %v1405_v18, %v1398_v21  ;;  %v1757_v18 = vld [vmem:[%s2561_s24] ss:$0 sm:$0xff] }
 0xd90   :  { %1414 = vrot.lane.b32.xlu0 %v1409_v4, %s1803_s18 }
 0xde2   :  { %v1413_v54 = vpop.permute.xlu2 %1412 }
 0xde3   :  { %v1418_v6 = vadd.f32 %v1413_v54, %v1332_v52  ;;  %v1580_v54 = vld [vmem:[%s2562_s6] sm:$0x3] }
 0xde5   :  { %1790 = vtanh.f32 %v1418_v6 }
 0xdeb   :  { %v1791_v48 = vpop.eup %1790 }
 0xdec   :  { %1426 = vrot.lane.b32.xlu1 %v1791_v48, %s1805_s0 }
 0xe02   :  { %v1415_v55 = vpop.permute.xlu0 %1414 }
 0xe03   :  { %v1419_v61 = vadd.f32 %v1415_v55, %v1335_v58 }
 0xe05   :  { %1792 = vtanh.f32 %v1419_v61 }
 0xe0b   :  { %v1793_v56 = vpop.eup %1792 }
 0xe0c   :  { %1428 = vrot.lane.b32.xlu2 %v1793_v56, %s1805_s0 }
 0xe5e   :  { %v1427_v20 = vpop.permute.xlu1 %1426 }
 0xe5f   :  { %v1432_v31 = vmul.f32 %v1427_v20, %v1422_v60 }
 0xe61   :  { %v1436_v8 = vadd.f32 %v1434_v24, %v1432_v31 }
 0xe63   :  { %1446 = vrot.lane.b32.xlu0 %v1436_v8, %s1805_s0 }
 0xe66   :  { %v1429_v34 = vpop.permute.xlu2 %1428 }
 0xe67   :  { %v1433_v35 = vmul.f32 %v1429_v34, %v1423_v33 }
 0xe69   :  { %v1437_v36 = vadd.f32 %v1435_v17, %v1433_v35 }
 0xe6b   :  { %1448 = vrot.lane.b32.xlu1 %v1437_v36, %s1805_s0 }
 0xed5   :  { %v1447_v37 = vpop.permute.xlu0 %1446 }
 0xed6   :  { %1738 = vmatmul.msk.f32.vlgmr.msra.gmra.mxu0 %vm196_vm3, %v1447_v37 }
 0xedd   :  { %v1449_v38 = vpop.permute.xlu1 %1448 }
 0xede   :  { %1739 = vmatmul.msk.f32.gmra.mxu0 %vm196_vm3, %v1449_v38 }
 0xf53   :  { %v1471_v14 = vpop.f32.mrf.mxu0 }
 0xf54   :  { %v1472_v39 = vadd.f32 %v1756_v25, %v1471_v14 }
 0xf56   :  { %1517 = vrot.lane.b32.xlu0 %v1472_v39, %s1802_s11  ;;  %v1740_v30 = vmul.f32 -1.442695, %v1472_v39 }
 0xf5b   :  { %v1474_v26 = vpop.f32.mrf.mxu0 }
 0xf5c   :  { %v1475_v9 = vadd.f32 %v1756_v25, %v1474_v26 }
 0xf5e   :  { %1519 = vrot.lane.b32.xlu2 %v1475_v9, %s1802_s11  ;;  %v1741_v27 = vmul.f32 -1.442695, %v1475_v9 }
 0xf60   :  { %1794 = vpow2.f32 %v1741_v27 }
 0xf66   :  { %v1795_v28 = vpop.eup %1794 }
 0xf67   :  { %v1484_v29 = vadd.f32 1.0, %v1795_v28 }
 0xf69   :  { %1796 = vrcp.f32 %v1484_v29  ;;  %v1511_v46 = vand.u32 2147483648, %v1484_v29  ;;  %vm1505_vm8 = vweird.f32 %v1484_v29  ;;  %v1509_v59 = vand.u32 2147483647, %v1484_v29 }
 0xf6a   :  { %1798 = vpow2.f32 %v1740_v30 }
 0xf6b   :  { %v1512_v63 = vor.u32 1.1754944e-38, %v1511_v46  ;;  %vm1510_vm10 = vcmp.eq.f32.partialorder %v1509_v59, 8.507059e+37 }
 0xf6f   :  { %v1797_v32 = vpop.eup %1796 }
 0xf70   :  { %v1799_v52 = vpop.eup %1798  ;;  %v1501_v53 = vmul.f32 %v1797_v32, %v1484_v29  ;;  %vm1506_vm7 = vweird.f32 %v1797_v32 }
 0xf71   :  { %v1483_v40 = vadd.f32 1.0, %v1799_v52  ;;  %vm1507_vm9 = vmor %vm1505_vm8, %vm1506_vm7 }
 0xf72   :  { %v1502_v58 = vsub.f32 1.0, %v1501_v53 }
 0xf73   :  { %1800 = vrcp.f32 %v1483_v40  ;;  %v1496_v13 = vand.u32 2147483648, %v1483_v40  ;;  %vm1490_vm11 = vweird.f32 %v1483_v40  ;;  %v1494_v49 = vand.u32 2147483647, %v1483_v40 }
 0xf74   :  { %v1503_v42 = vmul.f32 %v1797_v32, %v1502_v58 }
 0xf75   :  { %v1497_v51 = vor.u32 1.1754944e-38, %v1496_v13  ;;  %vm1495_vm13 = vcmp.eq.f32.partialorder %v1494_v49, 8.507059e+37 }
 0xf76   :  { %v1504_v44 = vadd.f32 %v1797_v32, %v1503_v42 }
 0xf78   :  { %v1508_v47 = vsel %vm1507_vm9, %v1797_v32, %v1504_v44 }
 0xf79   :  { %v1801_v45 = vpop.eup %1800  ;;  %v1513_v0 = vsel %vm1510_vm10, %v1512_v63, %v1508_v47 }
 0xf7a   :  { %v1486_v62 = vmul.f32 %v1801_v45, %v1483_v40  ;;  %vm1491_vm5 = vweird.f32 %v1801_v45 }
 0xf7b   :  { %vm1492_vm12 = vmor %vm1490_vm11, %vm1491_vm5 }
 0xf7c   :  { %v1487_v1 = vsub.f32 1.0, %v1486_v62 }
 0xf7e   :  { %v1488_v16 = vmul.f32 %v1801_v45, %v1487_v1 }
 0xf80   :  { %v1489_v2 = vadd.f32 %v1801_v45, %v1488_v16 }
 0xf82   :  { %v1493_v50 = vsel %vm1492_vm12, %v1801_v45, %v1489_v2 }
 0xf83   :  { %v1498_v11 = vsel %vm1495_vm13, %v1497_v51, %v1493_v50 }
 0xfb8   :  { %v1520_v3 = vpop.permute.xlu2 %1519 }
 0xfb9   :  { %v1524_v5 = vmul.f32 %v1520_v3, %v1513_v0 }
 0xfbb   :  { %1543 = vmatpush.msra.mxu1 %v1524_v5 }
 0xfc8   :  { %v1518_v10 = vpop.permute.xlu0 %1517 }
 0xfc9   :  { %v1523_v12 = vmul.f32 %v1518_v10, %v1498_v11 }
 0xfcb   :  { %1544 = vmatpush.msra.mxu1 %v1523_v12 }
 0xfcc   :  { %1742 = vmatmul.msk.f32.vlgmr.msra.gmra.mxu1 %vm196_vm3, %v1525_v15  ;;  %vm1608_vm3 = vcmask 254976  }
0x1049   :  { %v1546_v23 = vpop.f32.mrf.mxu1 }
0x104a   :  { %1743 = vmatmul.msk.f32.vlgmr.msrb.gmra.mxu2 %vm462_vm4, %v1546_v23  ;;  %vm1613_vm4 = vcmask 1024  }
0x10cd   :  { %v1577_v21 = vpop.f32.mrf.mxu2 }
0x10ce   :  { %v1578_v4 = vadd.f32 %v1757_v18, %v1577_v21 }
0x10d0   :  { %1744 = vmatpush.msk.msra.mxu3 %vm139_vm1, %v1578_v4 }
0x10d1   :  { %1745 = vmatmul.msk.f32.vlgmr.msra.gmra.mxu3 %vm126_vm2, %v1580_v54 }
0x1154   :  { %v1604_v6 = vpop.f32.mrf.mxu3 }
0x1155   :  { %v1607_v48 = vmax.f32 %v1604_v6, 0.0 }
0x1157   :  { %v1609_v55 = vsel %vm1608_vm3, %v1607_v48, 0.0 }
0x1158   :  { %1610 = vadd.xlane.f32.xlu1 %v1609_v55 }
0x11cb   :  { %v1611_v61 = vpop.xlane.xlu1 %1610 }
0x11cc   :  { %v1612_v56 = vsub.f32 0.0, %v1611_v61 }
0x11ce   :  { %1614 = vst.msk [vmem:[%s2563_s25] sm:$0x3] %vm1613_vm4, %v1612_v56 }

</bundles_post_ra>
